<compile_context>
chip_gen: v7x
topology: tpu7x:2x2x1
jax: 0.10.0
libtpu: 0.0.40
codegen_flags: <defaults>
</compile_context>

<pallas_src>
import jax
import jax.numpy as jnp
from jax import lax
from jax.experimental import pallas as pl
from jax.experimental.pallas import tpu as pltpu

HIDDEN = 256
STATE_DIM = 50


# ----------------------------- Pallas kernel -------------------------------
def critic_kernel(xa_ref, xs_ref, w1_ref, b1_ref, w2_ref, b2_ref, w3t_ref,
                  b3_ref, o_ref):
    # NT branch matmuls: W[f, k] contracted against x[b, k] -> h^T[f, b].
    nt = (((1,), (1,)), ((), ()))
    xa = xa_ref[...].astype(jnp.bfloat16)            # [TB, A]
    xs = xs_ref[...].astype(jnp.bfloat16)            # [TB, 50]

    h_act = lax.dot_general(w1_ref[...], xa, nt,
                            preferred_element_type=jnp.float32)   # [H, TB]
    h_st = lax.dot_general(w2_ref[...], xs, nt,
                           preferred_element_type=jnp.float32)    # [H, TB]
    # f32 bias + relu (bias column broadcast across the batch lanes).
    h_act = jnp.maximum(h_act + b1_ref[...], 0.0)                 # [H, TB]
    h_st = jnp.maximum(h_st + b2_ref[...], 0.0)                   # [H, TB]

    # Bilinear head, feature-major: t^T = W3^T @ h_st^T -> [H, TB].
    t = jnp.dot(w3t_ref[...], h_st.astype(jnp.bfloat16),
                preferred_element_type=jnp.float32)               # [H, TB]
    # Reduce over the sublane (feature) axis -> lane-dense [1, TB] output.
    o_ref[...] = jnp.sum(t * h_act, axis=0, keepdims=True) + b3_ref[0]


# ------------------------------ wrapper -------------------------------------
def _round_up(x, m):
    return (x + m - 1) // m * m


def critic_net_forward(state, action_probs, kernel_params, *, block_batch=2048):
    """state: [B, 50] f32, action_probs: [B, A] f32 -> [B, 1] f32."""
    w1, b1, w2, b2, w3t, b3 = kernel_params
    B = state.shape[0]
    A = action_probs.shape[1]

    # Balanced, lane-aligned (x128) batch tiles; >= 2 grid steps once B is big
    # enough so the "parallel" axis can feed both v7x TensorCores.
    num_tiles = max(pl.cdiv(B, block_batch), 2 if B >= 256 else 1)
    tb = _round_up(pl.cdiv(B, num_tiles), 128)
    b_pad = num_tiles * tb
    if b_pad != B:
        state = jnp.pad(state, ((0, b_pad - B), (0, 0)))
        action_probs = jnp.pad(action_probs, ((0, b_pad - B), (0, 0)))

    out = pl.pallas_call(
        critic_kernel,
        out_shape=jax.ShapeDtypeStruct((1, b_pad), jnp.float32),
        grid_spec=pltpu.PrefetchScalarGridSpec(
            num_scalar_prefetch=0,
            grid=(num_tiles,),
            in_specs=[
                pl.BlockSpec((tb, A), lambda i: (i, 0)),              # action tile
                pl.BlockSpec((tb, STATE_DIM), lambda i: (i, 0)),      # state tile
                pl.BlockSpec((HIDDEN, A), lambda i: (0, 0)),          # W1 (resident)
                pl.BlockSpec((HIDDEN, 1), lambda i: (0, 0)),          # b1 column
                pl.BlockSpec((HIDDEN, STATE_DIM), lambda i: (0, 0)),  # W2 (resident)
                pl.BlockSpec((HIDDEN, 1), lambda i: (0, 0)),          # b2 column
                pl.BlockSpec((HIDDEN, HIDDEN), lambda i: (0, 0)),     # W3^T (resident)
                pl.BlockSpec(memory_space=pltpu.MemorySpace.SMEM),    # scalar b3
            ],
            out_specs=pl.BlockSpec((1, tb), lambda i: (0, i)),
        ),
        compiler_params=pltpu.CompilerParams(
            dimension_semantics=("parallel",),
            vmem_limit_bytes=32 * 1024 * 1024),
    )(action_probs, state, w1, b1, w2, b2, w3t, b3)
    return out[0, :B].reshape(B, 1)


# ------------------------- parameter construction --------------------------
def _spectral_normalize(w, key, n_power_iterations=1, eps=1e-12):
    """Mimics torch.nn.utils.spectral_norm at forward time: divide the weight
    by its largest singular value estimated via power iteration (dim=0)."""
    w_mat = w.reshape(w.shape[0], -1)
    u = jax.random.normal(key, (w_mat.shape[0],), dtype=jnp.float32)
    u = u / (jnp.linalg.norm(u) + eps)
    v = None
    for _ in range(n_power_iterations):
        v = w_mat.T @ u
        v = v / (jnp.linalg.norm(v) + eps)
        u = w_mat @ v
        u = u / (jnp.linalg.norm(u) + eps)
    sigma = u @ (w_mat @ v)
    return w / sigma


def make_params(num_actions, key):
    """Deterministic synthetic parameters with PyTorch-style uniform init.

    Returns (kernel_params, ref_params):
      kernel_params: bf16-cast / re-laid-out tensors in the kernel's layout.
      ref_params:    raw f32 PyTorch-layout tensors for the reference.
    """
    ks = jax.random.split(key, 9)

    def uniform(k, shape, bound):
        return jax.random.uniform(k, shape, jnp.float32, -bound, bound)

    # fc1: Linear(num_actions, 256); PyTorch weight layout [out, in].
    bound1 = 1.0 / (num_actions ** 0.5)
    w1 = uniform(ks[0], (HIDDEN, num_actions), bound1)
    b1 = uniform(ks[1], (HIDDEN,), bound1)
    # fc2: Linear(50, 256)
    bound2 = 1.0 / (STATE_DIM ** 0.5)
    w2 = uniform(ks[2], (HIDDEN, STATE_DIM), bound2)
    b2 = uniform(ks[3], (HIDDEN,), bound2)
    # bfc3: Bilinear(256, 256, 1) -> weight [1, in1, in2], bias [1]
    bound3 = 1.0 / (HIDDEN ** 0.5)
    w3 = uniform(ks[4], (1, HIDDEN, HIDDEN), bound3)
    b3 = uniform(ks[5], (1,), bound3)

    # spectral_norm (single power iteration, PyTorch default).
    # TODO(synk): PyTorch carries the power-iteration vector u across forward
    # passes; here u is re-drawn once at parameter-build time.
    w1 = _spectral_normalize(w1, ks[6])
    w2 = _spectral_normalize(w2, ks[7])
    w3 = _spectral_normalize(w3, ks[8])

    kernel_params = (
        w1.astype(jnp.bfloat16),        # [256, A]     (PyTorch layout)
        b1.reshape(HIDDEN, 1),          # [256, 1] f32 (bias column)
        w2.astype(jnp.bfloat16),        # [256, 50]
        b2.reshape(HIDDEN, 1),          # [256, 1] f32
        w3[0].T.astype(jnp.bfloat16),   # [256, 256] = W3^T (in2 x in1)
        b3.astype(jnp.float32),         # [1] scalar (SMEM)
    )
    ref_params = (w1, b1, w2, b2, w3, b3)
    return kernel_params, ref_params


# ------------------------------ references ----------------------------------
def reference_forward(state, action_probs, ref_params):
    """Full-f32 PyTorch-semantics math (no fusion, no bf16)."""
    w1, b1, w2, b2, w3, b3 = ref_params
    h_act = jnp.maximum(action_probs @ w1.T + b1, 0.0)
    h_st = jnp.maximum(state @ w2.T + b2, 0.0)
    return jnp.einsum('bi,oij,bj->bo', h_st, w3, h_act) + b3


def reference_forward_bf16(state, action_probs, kernel_params):
    """Mirrors the kernel's exact math (bf16 MXU operands, f32 accumulation)."""
    w1, b1, w2, b2, w3t, b3 = kernel_params
    xa = action_probs.astype(jnp.bfloat16).astype(jnp.float32)
    xs = state.astype(jnp.bfloat16).astype(jnp.float32)
    h_act = jnp.maximum(xa @ w1.astype(jnp.float32).T + b1[:, 0], 0.0)
    h_st = jnp.maximum(xs @ w2.astype(jnp.float32).T + b2[:, 0], 0.0)
    t = h_st.astype(jnp.bfloat16).astype(jnp.float32) @ w3t.astype(jnp.float32).T
    return jnp.sum(t * h_act, axis=-1, keepdims=True) + b3


# --------------------------------- driver -----------------------------------
if __name__ == "__main__":
    num_actions = 4
    batch = 8

    key = jax.random.PRNGKey(0)
    k_params, k_state, k_action = jax.random.split(key, 3)

    kernel_params, ref_params = make_params(num_actions, k_params)
    state = jax.random.normal(k_state, (batch, STATE_DIM), dtype=jnp.float32)
    # action_probs: simulate a probability vector per batch row
    action_probs = jax.nn.softmax(
        jax.random.normal(k_action, (batch, num_actions), dtype=jnp.float32),
        axis=-1,
    )

    out = critic_net_forward(state, action_probs, kernel_params)
    out = jax.block_until_ready(out)
    assert out.shape == (batch, 1)

    # Tight check: kernel vs the exact math it implements (bf16 ops, f32 acc).
    ref_bf16 = reference_forward_bf16(state, action_probs, kernel_params)
    assert jnp.allclose(out, ref_bf16, atol=1e-3, rtol=1e-3)

    # Loose check: kernel vs full-f32 module semantics (only bf16 rounding diff).
    ref = reference_forward(state, action_probs, ref_params)
    assert jnp.allclose(out, ref, atol=5e-2, rtol=5e-2)

    print("KERNEL_OK")
</pallas_src>

<mosaic_0001>
module attributes {stable_mosaic.version = 11 : i64} {
  func.func @critic_kernel(%arg0: i32, %arg1: memref<128x4xf32, #tpu.memory_space<vmem>>, %arg2: memref<128x50xf32, #tpu.memory_space<vmem>>, %arg3: memref<256x4xbf16, #tpu.memory_space<vmem>>, %arg4: memref<256x1xf32, #tpu.memory_space<vmem>>, %arg5: memref<256x50xbf16, #tpu.memory_space<vmem>>, %arg6: memref<256x1xf32, #tpu.memory_space<vmem>>, %arg7: memref<256x256xbf16, #tpu.memory_space<vmem>>, %arg8: memref<1xf32, #tpu.memory_space<smem>>, %arg9: memref<1x128xf32, #tpu.memory_space<vmem>>) attributes {dimension_semantics = [#tpu.dimension_semantics<parallel>], iteration_bounds = array<i64: 1>, scalar_prefetch = 0 : i64, scratch_operands = 0 : i64, tpu.core_type = #tpu.core_type<tc>, window_params = [{transform_indices = @transform_0, window_bounds = array<i64: 128, 4>}, {transform_indices = @transform_1, window_bounds = array<i64: 128, 50>}, {pipeline_mode = #tpu.pipeline_mode<synchronous>, transform_indices = @transform_2, window_bounds = array<i64: 256, 4>}, {pipeline_mode = #tpu.pipeline_mode<synchronous>, transform_indices = @transform_3, window_bounds = array<i64: 256, 1>}, {pipeline_mode = #tpu.pipeline_mode<synchronous>, transform_indices = @transform_4, window_bounds = array<i64: 256, 50>}, {pipeline_mode = #tpu.pipeline_mode<synchronous>, transform_indices = @transform_5, window_bounds = array<i64: 256, 1>}, {pipeline_mode = #tpu.pipeline_mode<synchronous>, transform_indices = @transform_6, window_bounds = array<i64: 256, 256>}, {transform_indices = @transform_7, window_bounds = array<i64: 1>}, {transform_indices = @transform_8, window_bounds = array<i64: 1, 128>}]} {
    %c0 = arith.constant 0 : index
    %c0_0 = arith.constant 0 : index
    %0 = vector.load %arg1[%c0, %c0_0] : memref<128x4xf32, #tpu.memory_space<vmem>>, vector<128x4xf32>
    %1 = arith.truncf %0 : vector<128x4xf32> to vector<128x4xbf16>
    %c0_1 = arith.constant 0 : index
    %c0_2 = arith.constant 0 : index
    %2 = vector.load %arg2[%c0_1, %c0_2] : memref<128x50xf32, #tpu.memory_space<vmem>>, vector<128x50xf32>
    %3 = arith.truncf %2 : vector<128x50xf32> to vector<128x50xbf16>
    %c0_3 = arith.constant 0 : index
    %c0_4 = arith.constant 0 : index
    %4 = vector.load %arg3[%c0_3, %c0_4] : memref<256x4xbf16, #tpu.memory_space<vmem>>, vector<256x4xbf16>
    %cst = arith.constant dense<0.000000e+00> : vector<256x128xf32>
    %5 = tpu.matmul %4, %1, %cst {dimension_numbers = #tpu.dot_dimension_numbers<[1], [1], [0], [0], [0, 0, 1, 0], [], []>} : vector<256x4xbf16>, vector<128x4xbf16>, vector<256x128xf32> -> vector<256x128xf32>
    %c0_5 = arith.constant 0 : index
    %c0_6 = arith.constant 0 : index
    %6 = vector.load %arg5[%c0_5, %c0_6] : memref<256x50xbf16, #tpu.memory_space<vmem>>, vector<256x50xbf16>
    %cst_7 = arith.constant dense<0.000000e+00> : vector<256x128xf32>
    %7 = tpu.matmul %6, %3, %cst_7 {dimension_numbers = #tpu.dot_dimension_numbers<[1], [1], [0], [0], [0, 0, 1, 0], [], []>} : vector<256x50xbf16>, vector<128x50xbf16>, vector<256x128xf32> -> vector<256x128xf32>
    %c0_8 = arith.constant 0 : index
    %c0_9 = arith.constant 0 : index
    %8 = vector.load %arg4[%c0_8, %c0_9] : memref<256x1xf32, #tpu.memory_space<vmem>>, vector<256x1xf32>
    %9 = vector.broadcast %8 : vector<256x1xf32> to vector<256x128xf32>
    %10 = arith.addf %5, %9 : vector<256x128xf32>
    %cst_10 = arith.constant 0.000000e+00 : f32
    %11 = vector.broadcast %cst_10 : f32 to vector<256x128xf32>
    %12 = arith.maximumf %10, %11 : vector<256x128xf32>
    %c0_11 = arith.constant 0 : index
    %c0_12 = arith.constant 0 : index
    %13 = vector.load %arg6[%c0_11, %c0_12] : memref<256x1xf32, #tpu.memory_space<vmem>>, vector<256x1xf32>
    %14 = vector.broadcast %13 : vector<256x1xf32> to vector<256x128xf32>
    %15 = arith.addf %7, %14 : vector<256x128xf32>
    %cst_13 = arith.constant 0.000000e+00 : f32
    %16 = vector.broadcast %cst_13 : f32 to vector<256x128xf32>
    %17 = arith.maximumf %15, %16 : vector<256x128xf32>
    %c0_14 = arith.constant 0 : index
    %c0_15 = arith.constant 0 : index
    %18 = vector.load %arg7[%c0_14, %c0_15] : memref<256x256xbf16, #tpu.memory_space<vmem>>, vector<256x256xbf16>
    %19 = arith.truncf %17 : vector<256x128xf32> to vector<256x128xbf16>
    %cst_16 = arith.constant dense<0.000000e+00> : vector<256x128xf32>
    %20 = tpu.matmul %18, %19, %cst_16 {dimension_numbers = #tpu.dot_dimension_numbers<[1], [0], [0], [1], [0, 0, 1, 1], [], []>} : vector<256x256xbf16>, vector<256x128xbf16>, vector<256x128xf32> -> vector<256x128xf32>
    %21 = arith.mulf %20, %12 : vector<256x128xf32>
    %cst_17 = arith.constant dense<0.000000e+00> : vector<128xf32>
    %22 = vector.multi_reduction <add>, %21, %cst_17 [0] : vector<256x128xf32> to vector<128xf32>
    %23 = vector.shape_cast %22 : vector<128xf32> to vector<1x128xf32>
    %c0_18 = arith.constant 0 : index
    %24 = memref.load %arg8[%c0_18] : memref<1xf32, #tpu.memory_space<smem>>
    %25 = vector.broadcast %24 : f32 to vector<1x128xf32>
    %26 = arith.addf %23, %25 : vector<1x128xf32>
    %c0_19 = arith.constant 0 : index
    %c0_20 = arith.constant 0 : index
    %27 = vector.load %arg9[%c0_19, %c0_20] : memref<1x128xf32, #tpu.memory_space<vmem>>, vector<1x128xf32>
    tpu.vector_store %arg9[%c0_19, %c0_20], %26 {strides = array<i32>} : memref<1x128xf32, #tpu.memory_space<vmem>>, vector<1x128xf32>,
    return
  }
  func.func @transform_0(%arg0: i32) -> (i32, i32) {
    %c0_i32 = arith.constant 0 : i32
    %c0_i32_0 = arith.constant 0 : i32
    return %arg0, %c0_i32 : i32, i32
  }
  func.func @transform_1(%arg0: i32) -> (i32, i32) {
    %c0_i32 = arith.constant 0 : i32
    %c0_i32_0 = arith.constant 0 : i32
    return %arg0, %c0_i32 : i32, i32
  }
  func.func @transform_2(%arg0: i32) -> (i32, i32) {
    %c0_i32 = arith.constant 0 : i32
    %c0_i32_0 = arith.constant 0 : i32
    %c0_i32_1 = arith.constant 0 : i32
    return %c0_i32, %c0_i32_0 : i32, i32
  }
  func.func @transform_3(%arg0: i32) -> (i32, i32) {
    %c0_i32 = arith.constant 0 : i32
    %c0_i32_0 = arith.constant 0 : i32
    %c0_i32_1 = arith.constant 0 : i32
    return %c0_i32, %c0_i32_0 : i32, i32
  }
  func.func @transform_4(%arg0: i32) -> (i32, i32) {
    %c0_i32 = arith.constant 0 : i32
    %c0_i32_0 = arith.constant 0 : i32
    %c0_i32_1 = arith.constant 0 : i32
    return %c0_i32, %c0_i32_0 : i32, i32
  }
  func.func @transform_5(%arg0: i32) -> (i32, i32) {
    %c0_i32 = arith.constant 0 : i32
    %c0_i32_0 = arith.constant 0 : i32
    %c0_i32_1 = arith.constant 0 : i32
    return %c0_i32, %c0_i32_0 : i32, i32
  }
  func.func @transform_6(%arg0: i32) -> (i32, i32) {
    %c0_i32 = arith.constant 0 : i32
    %c0_i32_0 = arith.constant 0 : i32
    %c0_i32_1 = arith.constant 0 : i32
    return %c0_i32, %c0_i32_0 : i32, i32
  }
  func.func @transform_7(%arg0: i32) -> i32 {
    %c0_i32 = arith.constant 0 : i32
    %c0_i32_0 = arith.constant 0 : i32
    return %c0_i32 : i32
  }
  func.func @transform_8(%arg0: i32) -> (i32, i32) {
    %c0_i32 = arith.constant 0 : i32
    %c0_i32_0 = arith.constant 0 : i32
    return %c0_i32, %arg0 : i32, i32
  }
}

</mosaic_0001>

<bundles_post_ra>
// kernel: tpu_custom_call.1
= control target key start
LH: loop header
LB: loop body
LE: loop exit
PB: predicated region body
PF: predicated region fallthrough
CT: control target
= control target key end

     0   :  { %vm416_vm0 = vcmask 31744   ;;  %v2152_v5 = vmov 0   ;;  %vm954_vm1 = vcmask 408576   ;;  %s2926_s0 = inlined_call_operand.vmem [shape: f32[128,4], index: 0, kind: input, shape index: {}]   ;;  %s2927_s1 = inlined_call_operand.vmem [shape: f32[128,50], index: 1, kind: input, shape index: {}]   ;;  %s2928_s2 = inlined_call_operand.vmem [shape: bf16[256,4], index: 2, kind: input, shape index: {}]   ;;  %s2929_s3 = inlined_call_operand.vmem [shape: f32[256,1], index: 3, kind: input, shape index: {}]   ;;  %s2930_s4 = inlined_call_operand.vmem [shape: bf16[256,50], index: 4, kind: input, shape index: {}]   ;;  %s2931_s5 = inlined_call_operand.vmem [shape: f32[256,1], index: 5, kind: input, shape index: {}]   ;;  %s2932_s6 = inlined_call_operand.vmem [shape: bf16[256,256], index: 6, kind: input, shape index: {}]   ;;  %s2933_s7 = inlined_call_operand.<no memory space> [shape: f32[1], index: 7, kind: input, shape index: {}]   ;;  %s2934_s8 = inlined_call_operand.hbm [shape: f32[1,128], index: 8, kind: output, shape index: {}]  }
   0x1   :  { %v32_v0 = vld [vmem:[%s2926_s0] sm:$0xff]  ;;  %v33_v1 = vld [vmem:[%s2926_s0 + $0x8] sm:$0xff]  ;;  %v34_v2 = vld [vmem:[%s2926_s0 + $0x10] sm:$0xff]  ;;  %2046 = vset.pattern.permute.xlu0 %v2152_v5  ;;  %2047 = vset.pattern.permute.xlu1 %v2152_v5 }
   0x2   :  { %v48_v3 = vpack.c.bf16 %v33_v1, %v32_v0  ;;  %v35_v4 = vld [vmem:[%s2926_s0 + $0x18] sm:$0xff]  ;;  %v36_v8 = vld [vmem:[%s2926_s0 + $0x20] sm:$0xff]  ;;  %v37_v9 = vld [vmem:[%s2926_s0 + $0x28] sm:$0xff] }
   0x3   :  { %v49_v6 = vpack.c.bf16 %v35_v4, %v34_v2  ;;  %v2048_v10 = vld [vmem:[%s2928_s2] sm:$0xff]   ;;  %v50_v12 = vpack.c.bf16 %v37_v9, %v36_v8  ;;  %v38_v13 = vld [vmem:[%s2926_s0 + $0x30] sm:$0xff]  ;;  %v39_v16 = vld [vmem:[%s2926_s0 + $0x38] sm:$0xff] }
   0x4   :  { %2028 = vmatprep.subr.msk.bf16.mxu1 %vm416_vm0, %v48_v3  ;;  %v466_v7 = vsel %vm416_vm0, %v48_v3, 0  ;;  %1948 = vmatprep.mubr.msk.bf16.mxu1 %vm416_vm0, %v2048_v10  ;;  %v698_v14 = vld [vmem:[%s2931_s5 + $0x80] sm:$0xff]  ;;  %v699_v17 = vld [vmem:[%s2931_s5 + $0x88] sm:$0xff]  ;;  %v51_v20 = vpack.c.bf16 %v39_v16, %v38_v13  ;;  %v700_v21 = vld [vmem:[%s2931_s5 + $0x90] sm:$0xff] }
   0x5   :  { %1933 = vmatpush3.bf16.xpose.msra.mxu1 %v466_v7  ;;  %v469_v11 = vsel %vm416_vm0, %v49_v6, 0  ;;  %v682_v15 = vld [vmem:[%s2931_s5] sm:$0xff]  ;;  %796 = vperm.xlu0 %2046, %v698_v14   ;;  %v683_v18 = vld [vmem:[%s2931_s5 + $0x8] sm:$0xff]  ;;  %v472_v19 = vsel %vm416_vm0, %v50_v12, 0  ;;  %v701_v22 = vld [vmem:[%s2931_s5 + $0x98] sm:$0xff] }
   0x6   :  { %2029 = vmatprep.subr.msk.bf16.mxu1 %vm416_vm0, %v49_v6  ;;  %716 = vperm.xlu1 %2047, %v682_v15   ;;  %v40_v23 = vld [vmem:[%s2926_s0 + $0x40] sm:$0xff]  ;;  %v41_v24 = vld [vmem:[%s2926_s0 + $0x48] sm:$0xff]  ;;  %v684_v25 = vld [vmem:[%s2931_s5 + $0x10] sm:$0xff]  ;;  %v475_v27 = vsel %vm416_vm0, %v51_v20, 0 }
   0x7   :  { %v685_v26 = vld [vmem:[%s2931_s5 + $0x18] sm:$0xff]  ;;  %v52_v28 = vpack.c.bf16 %v41_v24, %v40_v23  ;;  %v702_v29 = vld [vmem:[%s2931_s5 + $0xa0] sm:$0xff]  ;;  %v703_v30 = vld [vmem:[%s2931_s5 + $0xa8] sm:$0xff] }
   0x8   :  { %v42_v31 = vld [vmem:[%s2926_s0 + $0x50] sm:$0xff]  ;;  %v43_v32 = vld [vmem:[%s2926_s0 + $0x58] sm:$0xff]  ;;  %v686_v33 = vld [vmem:[%s2931_s5 + $0x20] sm:$0xff] }
   0x9   :  { %801 = vperm.xlu0 %2046, %v699_v17   ;;  %v687_v34 = vld [vmem:[%s2931_s5 + $0x28] sm:$0xff]  ;;  %v478_v35 = vsel %vm416_vm0, %v52_v28, 0  ;;  %v53_v36 = vpack.c.bf16 %v43_v32, %v42_v31  ;;  %v704_v37 = vld [vmem:[%s2931_s5 + $0xb0] sm:$0xff]  ;;  %v705_v38 = vld [vmem:[%s2931_s5 + $0xb8] sm:$0xff] }
   0xa   :  { %721 = vperm.xlu1 %2047, %v683_v18   ;;  %v44_v39 = vld [vmem:[%s2926_s0 + $0x60] sm:$0xff]  ;;  %v45_v40 = vld [vmem:[%s2926_s0 + $0x68] sm:$0xff]  ;;  %v688_v41 = vld [vmem:[%s2931_s5 + $0x30] sm:$0xff] }
   0xb   :  { %v689_v42 = vld [vmem:[%s2931_s5 + $0x38] sm:$0xff]  ;;  %v481_v43 = vsel %vm416_vm0, %v53_v36, 0  ;;  %v54_v44 = vpack.c.bf16 %v45_v40, %v44_v39  ;;  %v706_v45 = vld [vmem:[%s2931_s5 + $0xc0] sm:$0xff]  ;;  %v707_v46 = vld [vmem:[%s2931_s5 + $0xc8] sm:$0xff] }
   0xc   :  { %v46_v47 = vld [vmem:[%s2926_s0 + $0x70] sm:$0xff]  ;;  %v47_v48 = vld [vmem:[%s2926_s0 + $0x78] sm:$0xff]  ;;  %v690_v49 = vld [vmem:[%s2931_s5 + $0x40] sm:$0xff] }
   0xd   :  { %1935 = vmatpush3.bf16.xpose.msra.mxu1 %v469_v11  ;;  %806 = vperm.xlu0 %2046, %v700_v21   ;;  %v691_v50 = vld [vmem:[%s2931_s5 + $0x48] sm:$0xff]  ;;  %v484_v51 = vsel %vm416_vm0, %v54_v44, 0  ;;  %v55_v52 = vpack.c.bf16 %v47_v48, %v46_v47  ;;  %v708_v53 = vld [vmem:[%s2931_s5 + $0xd0] sm:$0xff]  ;;  %v709_v54 = vld [vmem:[%s2931_s5 + $0xd8] sm:$0xff] }
   0xe   :  { %2030 = vmatprep.subr.msk.bf16.mxu1 %vm416_vm0, %v50_v12  ;;  %811 = vperm.xlu1 %2047, %v701_v22   ;;  %v56_v55 = vld [vmem:[%s2927_s1] sm:$0xff]  ;;  %v57_v56 = vld [vmem:[%s2927_s1 + $0x8] sm:$0xff]  ;;  %v692_v57 = vld [vmem:[%s2931_s5 + $0x50] sm:$0xff] }
   0xf   :  { %v693_v58 = vld [vmem:[%s2931_s5 + $0x58] sm:$0xff]  ;;  %v487_v59 = vsel %vm416_vm0, %v55_v52, 0  ;;  %v72_v60 = vpack.c.bf16 %v57_v56, %v56_v55  ;;  %v710_v61 = vld [vmem:[%s2931_s5 + $0xe0] sm:$0xff]  ;;  %v711_v62 = vld [vmem:[%s2931_s5 + $0xe8] sm:$0xff] }
  0x10   :  { %v2049_v63 = vld [vmem:[%s2928_s2 + $0x8] sm:$0xff]   ;;  %v58_v0 = vld [vmem:[%s2927_s1 + $0x10] sm:$0xff]  ;;  %v59_v1 = vld [vmem:[%s2927_s1 + $0x18] sm:$0xff] }
  0x11   :  { %726 = vperm.xlu0 %2046, %v684_v25   ;;  %v2050_v2 = vld [vmem:[%s2928_s2 + $0x10] sm:$0xff]   ;;  %v694_v3 = vld [vmem:[%s2931_s5 + $0x60] sm:$0xff]  ;;  %v695_v4 = vld [vmem:[%s2931_s5 + $0x68] sm:$0xff]  ;;  %v1004_v5 = vsel %vm954_vm1, %v72_v60, 0  ;;  %v73_v6 = vpack.c.bf16 %v59_v1, %v58_v0 }
  0x12   :  { %731 = vperm.xlu1 %2047, %v685_v26   ;;  %v712_v7 = vld [vmem:[%s2931_s5 + $0xf0] sm:$0xff]  ;;  %v713_v8 = vld [vmem:[%s2931_s5 + $0xf8] sm:$0xff]  ;;  %v60_v9 = vld [vmem:[%s2927_s1 + $0x20] sm:$0xff] }
  0x13   :  { %v61_v10 = vld [vmem:[%s2927_s1 + $0x28] sm:$0xff]  ;;  %v2051_v11 = vld [vmem:[%s2928_s2 + $0x18] sm:$0xff]   ;;  %v696_v12 = vld [vmem:[%s2931_s5 + $0x70] sm:$0xff]  ;;  %v1007_v15 = vsel %vm954_vm1, %v73_v6, 0 }
  0x14   :  { %v697_v13 = vld [vmem:[%s2931_s5 + $0x78] sm:$0xff]  ;;  %v2052_v14 = vld [vmem:[%s2928_s2 + $0x20] sm:$0xff]   ;;  %v74_v16 = vpack.c.bf16 %v61_v10, %v60_v9 }
  0x15   :  { %1937 = vmatpush3.bf16.xpose.msra.mxu1 %v472_v19  ;;  %816 = vperm.xlu0 %2046, %v702_v29  }
  0x16   :  { %2031 = vmatprep.subr.msk.bf16.mxu1 %vm416_vm0, %v51_v20  ;;  %821 = vperm.xlu1 %2047, %v703_v30  }
  0x19   :  { %736 = vperm.xlu0 %2046, %v686_v33  }
  0x1a   :  { %741 = vperm.xlu1 %2047, %v687_v34  }
  0x1d   :  { %1939 = vmatpush3.bf16.xpose.msra.mxu1 %v475_v27  ;;  %826 = vperm.xlu0 %2046, %v704_v37  }
  0x1e   :  { %2032 = vmatprep.subr.msk.bf16.mxu1 %vm416_vm0, %v52_v28  ;;  %831 = vperm.xlu1 %2047, %v705_v38  }
  0x21   :  { %746 = vperm.xlu0 %2046, %v688_v41  }
  0x22   :  { %751 = vperm.xlu1 %2047, %v689_v42  }
  0x25   :  { %1941 = vmatpush3.bf16.xpose.msra.mxu1 %v478_v35  ;;  %836 = vperm.xlu0 %2046, %v706_v45  }
  0x26   :  { %2033 = vmatprep.subr.msk.bf16.mxu1 %vm416_vm0, %v53_v36  ;;  %841 = vperm.xlu1 %2047, %v707_v46  }
  0x29   :  { %756 = vperm.xlu0 %2046, %v690_v49  }
  0x2a   :  { %761 = vperm.xlu1 %2047, %v691_v50  }
  0x2d   :  { %1943 = vmatpush3.bf16.xpose.msra.mxu1 %v481_v43  ;;  %846 = vperm.xlu0 %2046, %v708_v53  }
  0x2e   :  { %2034 = vmatprep.subr.msk.bf16.mxu1 %vm416_vm0, %v54_v44  ;;  %851 = vperm.xlu1 %2047, %v709_v54  }
  0x31   :  { %766 = vperm.xlu0 %2046, %v692_v57  }
  0x32   :  { %771 = vperm.xlu1 %2047, %v693_v58  }
  0x35   :  { %1945 = vmatpush3.bf16.xpose.msra.mxu1 %v484_v51  ;;  %856 = vperm.xlu0 %2046, %v710_v61  }
  0x36   :  { %2035 = vmatprep.subr.msk.bf16.mxu1 %vm416_vm0, %v55_v52  ;;  %861 = vperm.xlu1 %2047, %v711_v62  }
  0x39   :  { %776 = vperm.xlu0 %2046, %v694_v3  }
  0x3a   :  { %781 = vperm.xlu1 %2047, %v695_v4  }
  0x3d   :  { %1947 = vmatpush3.bf16.xpose.msra.mxu1 %v487_v59  ;;  %866 = vperm.xlu0 %2046, %v712_v7  }
  0x3e   :  { %2036 = vmatprep.subr.msk.bf16.mxu1 %vm954_vm1, %v72_v60  ;;  %871 = vperm.xlu1 %2047, %v713_v8  }
  0x41   :  { %786 = vperm.xlu0 %2046, %v696_v12  }
  0x42   :  { %791 = vperm.xlu1 %2047, %v697_v13  }
  0x44   :  { %1949 = vmatmul.mubr.msk.bf16.vlgmr.msra.gmra.mrb[0].mxu1 %vm416_vm0, %v2049_v63 }
  0x45   :  { %1981 = vmatpush3.bf16.xpose.msra.mxu1 %v1004_v5  ;;  %1952 = vmatprep.mubr.msk.bf16.mxu1 %vm416_vm0, %v2050_v2 }
  0x46   :  { %2037 = vmatprep.subr.msk.bf16.mxu1 %vm954_vm1, %v73_v6 }
  0x47   :  { %14 = vsyncpa [#allocation4], 0  ;;  %v144_v17 = vld [vmem:[%s2929_s3] sm:$0xff]  ;;  %v145_v18 = vld [vmem:[%s2929_s3 + $0x8] sm:$0xff]  ;;  %v1010_v25 = vsel %vm954_vm1, %v74_v16, 0 }
  0x48   :  { %v62_v19 = vld [vmem:[%s2927_s1 + $0x30] sm:$0xff]  ;;  %v63_v20 = vld [vmem:[%s2927_s1 + $0x38] sm:$0xff]  ;;  %178 = vperm.xlu0 %2046, %v144_v17   ;;  %183 = vperm.xlu1 %2047, %v145_v18   ;;  %v2053_v21 = vld [vmem:[%s2928_s2 + $0x28] sm:$0xff]  }
  0x49   :  { %v146_v22 = vld [vmem:[%s2929_s3 + $0x10] sm:$0xff]  ;;  %v147_v23 = vld [vmem:[%s2929_s3 + $0x18] sm:$0xff]  ;;  %v75_v26 = vpack.c.bf16 %v63_v20, %v62_v19  ;;  %v148_v27 = vld [vmem:[%s2929_s3 + $0x20] sm:$0xff] }
  0x4a   :  { %v2054_v24 = vld [vmem:[%s2928_s2 + $0x30] sm:$0xff]   ;;  %v149_v28 = vld [vmem:[%s2929_s3 + $0x28] sm:$0xff]  ;;  %v64_v29 = vld [vmem:[%s2927_s1 + $0x40] sm:$0xff] }
  0x4b   :  { %v65_v30 = vld [vmem:[%s2927_s1 + $0x48] sm:$0xff]  ;;  %v2055_v31 = vld [vmem:[%s2928_s2 + $0x38] sm:$0xff]   ;;  %v150_v32 = vld [vmem:[%s2929_s3 + $0x30] sm:$0xff]  ;;  %v1013_v35 = vsel %vm954_vm1, %v75_v26, 0 }
  0x4c   :  { %1953 = vmatmul.mubr.msk.bf16.gmra.mrb[4].mxu1 %vm416_vm0, %v2051_v11  ;;  %188 = vperm.xlu0 %2046, %v146_v22   ;;  %v151_v33 = vld [vmem:[%s2929_s3 + $0x38] sm:$0xff]  ;;  %v2056_v34 = vld [vmem:[%s2928_s2 + $0x40] sm:$0xff]   ;;  %v76_v36 = vpack.c.bf16 %v65_v30, %v64_v29  ;;  %v153_v38 = vld [vmem:[%s2929_s3 + $0x48] sm:$0xff] }
  0x4d   :  { %1983 = vmatpush3.bf16.xpose.msra.mxu1 %v1007_v15  ;;  %1956 = vmatprep.mubr.msk.bf16.mxu1 %vm416_vm0, %v2052_v14  ;;  %v152_v37 = vld [vmem:[%s2929_s3 + $0x40] sm:$0xff]  ;;  %v66_v39 = vld [vmem:[%s2927_s1 + $0x50] sm:$0xff]  ;;  %v67_v40 = vld [vmem:[%s2927_s1 + $0x58] sm:$0xff] }
  0x4e   :  { %2038 = vmatprep.subr.msk.bf16.mxu1 %vm954_vm1, %v74_v16  ;;  %193 = vperm.xlu1 %2047, %v147_v23   ;;  %v2057_v41 = vld [vmem:[%s2928_s2 + $0x48] sm:$0xff]   ;;  %v154_v42 = vld [vmem:[%s2929_s3 + $0x50] sm:$0xff]  ;;  %v155_v43 = vld [vmem:[%s2929_s3 + $0x58] sm:$0xff]  ;;  %v1016_v45 = vsel %vm954_vm1, %v76_v36, 0  ;;  %v77_v46 = vpack.c.bf16 %v67_v40, %v66_v39 }
  0x4f   :  { %v2058_v44 = vld [vmem:[%s2928_s2 + $0x50] sm:$0xff]   ;;  %v156_v47 = vld [vmem:[%s2929_s3 + $0x60] sm:$0xff]  ;;  %v157_v48 = vld [vmem:[%s2929_s3 + $0x68] sm:$0xff] }
  0x50   :  { %198 = vperm.xlu0 %2046, %v148_v27   ;;  %v68_v49 = vld [vmem:[%s2927_s1 + $0x60] sm:$0xff]  ;;  %v69_v50 = vld [vmem:[%s2927_s1 + $0x68] sm:$0xff]  ;;  %v2059_v51 = vld [vmem:[%s2928_s2 + $0x58] sm:$0xff]   ;;  %v1019_v55 = vsel %vm954_vm1, %v77_v46, 0 }
  0x51   :  { %v158_v52 = vld [vmem:[%s2929_s3 + $0x70] sm:$0xff]  ;;  %v159_v53 = vld [vmem:[%s2929_s3 + $0x78] sm:$0xff]  ;;  %v2060_v54 = vld [vmem:[%s2928_s2 + $0x60] sm:$0xff]   ;;  %v78_v56 = vpack.c.bf16 %v69_v50, %v68_v49 }
  0x52   :  { %203 = vperm.xlu1 %2047, %v149_v28   ;;  %v160_v57 = vld [vmem:[%s2929_s3 + $0x80] sm:$0xff]  ;;  %v161_v58 = vld [vmem:[%s2929_s3 + $0x88] sm:$0xff]  ;;  %v70_v59 = vld [vmem:[%s2927_s1 + $0x70] sm:$0xff] }
  0x53   :  { %v71_v60 = vld [vmem:[%s2927_s1 + $0x78] sm:$0xff]  ;;  %v2061_v61 = vld [vmem:[%s2928_s2 + $0x68] sm:$0xff]   ;;  %v162_v62 = vld [vmem:[%s2929_s3 + $0x90] sm:$0xff]  ;;  %v1022_v1 = vsel %vm954_vm1, %v78_v56, 0 }
  0x54   :  { %1957 = vmatmul.mubr.msk.bf16.gmra.mrb[8].mxu1 %vm416_vm0, %v2053_v21  ;;  %208 = vperm.xlu0 %2046, %v150_v32   ;;  %v163_v63 = vld [vmem:[%s2929_s3 + $0x98] sm:$0xff]  ;;  %v2062_v0 = vld [vmem:[%s2928_s2 + $0x70] sm:$0xff]   ;;  %v79_v2 = vpack.c.bf16 %v71_v60, %v70_v59  ;;  %v164_v3 = vld [vmem:[%s2929_s3 + $0xa0] sm:$0xff] }
  0x55   :  { %1985 = vmatpush3.bf16.xpose.msra.mxu1 %v1010_v25  ;;  %1960 = vmatprep.mubr.msk.bf16.mxu1 %vm416_vm0, %v2054_v24  ;;  %v165_v4 = vld [vmem:[%s2929_s3 + $0xa8] sm:$0xff]  ;;  %v2063_v5 = vld [vmem:[%s2928_s2 + $0x78] sm:$0xff]   ;;  %v166_v6 = vld [vmem:[%s2929_s3 + $0xb0] sm:$0xff]  ;;  %s2153_s2 = smov [#allocation3]  }
  0x56   :  { %2039 = vmatprep.subr.msk.bf16.mxu1 %vm954_vm1, %v75_v26  ;;  %213 = vperm.xlu1 %2047, %v151_v33   ;;  %v167_v7 = vld [vmem:[%s2929_s3 + $0xb8] sm:$0xff]  ;;  %v2064_v8 = vld [vmem:[%s2930_s4] sm:$0xff]   ;;  %v1025_v9 = vsel %vm954_vm1, %v79_v2, 0  ;;  %v169_v11 = vld [vmem:[%s2929_s3 + $0xc8] sm:$0xff] }
  0x57   :  { %v168_v10 = vld [vmem:[%s2929_s3 + $0xc0] sm:$0xff]  ;;  %v2065_v12 = vld [vmem:[%s2930_s4 + $0x8] sm:$0xff]   ;;  %v170_v13 = vld [vmem:[%s2929_s3 + $0xd0] sm:$0xff] }
  0x58   :  { %218 = vperm.xlu0 %2046, %v152_v37   ;;  %v171_v14 = vld [vmem:[%s2929_s3 + $0xd8] sm:$0xff]  ;;  %v2066_v15 = vld [vmem:[%s2930_s4 + $0x10] sm:$0xff]   ;;  %v172_v16 = vld [vmem:[%s2929_s3 + $0xe0] sm:$0xff] }
  0x59   :  { %v173_v17 = vld [vmem:[%s2929_s3 + $0xe8] sm:$0xff]  ;;  %v2067_v18 = vld [vmem:[%s2930_s4 + $0x18] sm:$0xff]   ;;  %v174_v19 = vld [vmem:[%s2929_s3 + $0xf0] sm:$0xff] }
  0x5a   :  { %223 = vperm.xlu1 %2047, %v153_v38   ;;  %v175_v20 = vld [vmem:[%s2929_s3 + $0xf8] sm:$0xff]  ;;  %v2068_v21 = vld [vmem:[%s2930_s4 + $0x20] sm:$0xff]   ;;  %v2069_v22 = vld [vmem:[%s2930_s4 + $0x28] sm:$0xff]   ;;  %s1668_s3 = sshll.u32 %s2153_s2, 4  ;;  %s1669_s3 = int_to_ptr.vmem [resolvable:$true] %s1668_s3 }
  0x5b   :  { %v2070_v23 = vld [vmem:[%s2930_s4 + $0x30] sm:$0xff]   ;;  %v2071_v24 = vld [vmem:[%s2930_s4 + $0x38] sm:$0xff]   ;;  %v2072_v25 = vld [vmem:[%s2930_s4 + $0x40] sm:$0xff]   ;;  %s2128_s29 = scalar_lea.vmem %s1669_s3, 16  ;;  %s2132_s30 = scalar_lea.vmem %s1669_s3, 32 }
  0x5c   :  { %1961 = vmatmul.mubr.msk.bf16.gmra.mrb[12].mxu1 %vm416_vm0, %v2055_v31  ;;  %228 = vperm.xlu0 %2046, %v154_v42   ;;  %v2073_v26 = vld [vmem:[%s2930_s4 + $0x48] sm:$0xff]   ;;  %v2074_v27 = vld [vmem:[%s2930_s4 + $0x50] sm:$0xff]   ;;  %v2075_v28 = vld [vmem:[%s2930_s4 + $0x58] sm:$0xff]   ;;  %p2129_p0 = scmp.ne.s32.totalorder %s1669_s3, %s2128_s29  ;;  %p2133_p1 = scmp.lt.s32.totalorder %s1669_s3, %s1669_s3 }
  0x5d   :  { %1987 = vmatpush3.bf16.xpose.msra.mxu1 %v1013_v35  ;;  %1964 = vmatprep.mubr.msk.bf16.mxu1 %vm416_vm0, %v2056_v34  ;;  %v2076_v29 = vld [vmem:[%s2930_s4 + $0x60] sm:$0xff]   ;;  %v2077_v30 = vld [vmem:[%s2930_s4 + $0x68] sm:$0xff]   ;;  %v2078_v31 = vld [vmem:[%s2930_s4 + $0x70] sm:$0xff]   ;;  %p2134_p2 = scmp.lt.s32.totalorder %s2132_s30, %s2128_s29 }
  0x5e   :  { %2040 = vmatprep.subr.msk.bf16.mxu1 %vm954_vm1, %v76_v36  ;;  %233 = vperm.xlu1 %2047, %v155_v43   ;;  %v2079_v32 = vld [vmem:[%s2930_s4 + $0x78] sm:$0xff]  }
  0x5f   :  { %p2135_p3 = por %p2134_p2, %p2133_p1 }
  0x60   :  { %238 = vperm.xlu0 %2046, %v156_v47  }
  0x61   :  { %p2136_p4 = pnand %p2135_p3, %p2129_p0 }
  0x62   :  { %243 = vperm.xlu1 %2047, %v157_v48  }
  0x64   :  { %1965 = vmatmul.mubr.msk.bf16.gmra.mrb[16].mxu1 %vm416_vm0, %v2057_v41  ;;  %248 = vperm.xlu0 %2046, %v158_v52   ;;  %v2082_v41 = vld [vmem:[%s2932_s6 + $0x4] ss:$8 sps:$4 sm:$0xff]  }
  0x65   :  { %1989 = vmatpush3.bf16.xpose.msra.mxu1 %v1016_v45  ;;  %1968 = vmatprep.mubr.msk.bf16.mxu1 %vm416_vm0, %v2058_v44 }
  0x66   :  { %2041 = vmatprep.subr.msk.bf16.mxu1 %vm954_vm1, %v77_v46  ;;  %253 = vperm.xlu1 %2047, %v159_v53  }
  0x67   :  { %1460 = vmatprep.mubr.bf16.mxu0 %v2082_v41 }
  0x68   :  { %258 = vperm.xlu0 %2046, %v160_v57  }
  0x6a   :  { %263 = vperm.xlu1 %2047, %v161_v58  }
  0x6c   :  { %1969 = vmatmul.mubr.msk.bf16.gmra.mrb[20].mxu1 %vm416_vm0, %v2059_v51  ;;  %268 = vperm.xlu0 %2046, %v162_v62  }
  0x6d   :  { %1991 = vmatpush3.bf16.xpose.msra.mxu1 %v1019_v55  ;;  %1972 = vmatprep.mubr.msk.bf16.mxu1 %vm416_vm0, %v2060_v54 }
  0x6e   :  { %2042 = vmatprep.subr.msk.bf16.mxu1 %vm954_vm1, %v78_v56  ;;  %273 = vperm.xlu1 %2047, %v163_v63  }
  0x70   :  { %278 = vperm.xlu0 %2046, %v164_v3  }
  0x72   :  { %283 = vperm.xlu1 %2047, %v165_v4  }
  0x74   :  { %1973 = vmatmul.mubr.msk.bf16.gmra.mrb[24].mxu1 %vm416_vm0, %v2061_v61  ;;  %288 = vperm.xlu0 %2046, %v166_v6  }
  0x75   :  { %1993 = vmatpush3.bf16.xpose.msra.mxu1 %v1022_v1  ;;  %1976 = vmatprep.mubr.msk.bf16.mxu1 %vm416_vm0, %v2062_v0 }
  0x76   :  { %2043 = vmatprep.subr.msk.bf16.mxu1 %vm954_vm1, %v79_v2  ;;  %293 = vperm.xlu1 %2047, %v167_v7  }
  0x78   :  { %298 = vperm.xlu0 %2046, %v168_v10  }
  0x7a   :  { %303 = vperm.xlu1 %2047, %v169_v11  }
  0x7c   :  { %1977 = vmatmul.mubr.msk.bf16.gmra.mrb[28].mxu1 %vm416_vm0, %v2063_v5  ;;  %308 = vperm.xlu0 %2046, %v170_v13  }
  0x7d   :  { %1995 = vmatpush3.bf16.xpose.msra.mxu1 %v1025_v9  ;;  %1996 = vmatprep.mubr.msk.bf16.mxu1 %vm954_vm1, %v2064_v8 }
  0x7e   :  { %313 = vperm.xlu1 %2047, %v171_v14  }
  0x80   :  { %318 = vperm.xlu0 %2046, %v172_v16  }
  0x82   :  { %323 = vperm.xlu1 %2047, %v173_v17  }
  0x84   :  { %1997 = vmatmul.mubr.msk.bf16.vlgmr.msra.gmra.mrb[32].mxu1 %vm954_vm1, %v2065_v12  ;;  %328 = vperm.xlu0 %2046, %v174_v19   ;;  %v2647_v33 = vpop.permute.xlu0 %796 }
  0x85   :  { %2000 = vmatprep.mubr.msk.bf16.mxu1 %vm954_vm1, %v2066_v15  ;;  %v717_v34 = vpop.permute.xlu1 %716 }
  0x86   :  { %333 = vperm.xlu1 %2047, %v175_v20  }
  0x88   :  { %v2657_v39 = vpop.permute.xlu0 %801 }
  0x89   :  { %v722_v40 = vpop.permute.xlu1 %721 }
  0x8c   :  { %2001 = vmatmul.mubr.msk.bf16.gmra.mrb[36].mxu1 %vm954_vm1, %v2067_v18  ;;  %v2666_v44 = vpop.permute.xlu0 %806 }
  0x8d   :  { %2004 = vmatprep.mubr.msk.bf16.mxu1 %vm954_vm1, %v2068_v21  ;;  %v2672_v47 = vpop.permute.xlu1 %811 }
  0x90   :  { %v727_v48 = vpop.permute.xlu0 %726 }
  0x91   :  { %v732_v51 = vpop.permute.xlu1 %731 }
  0x94   :  { %2005 = vmatmul.mubr.msk.bf16.gmra.mrb[40].mxu1 %vm954_vm1, %v2069_v22  ;;  %v2682_v54 = vpop.permute.xlu0 %816 }
  0x95   :  { %2008 = vmatprep.mubr.msk.bf16.mxu1 %vm954_vm1, %v2070_v23  ;;  %v2684_v55 = vpop.permute.xlu1 %821 }
  0x98   :  { %v737_v60 = vpop.permute.xlu0 %736 }
  0x99   :  { %v742_v61 = vpop.permute.xlu1 %741 }
  0x9c   :  { %2009 = vmatmul.mubr.msk.bf16.gmra.mrb[44].mxu1 %vm954_vm1, %v2071_v24  ;;  %v2698_v0 = vpop.permute.xlu0 %826 }
  0x9d   :  { %2012 = vmatprep.mubr.msk.bf16.mxu1 %vm954_vm1, %v2072_v25  ;;  %v2704_v3 = vpop.permute.xlu1 %831 }
  0xa0   :  { %v747_v4 = vpop.permute.xlu0 %746 }
  0xa1   :  { %v752_v7 = vpop.permute.xlu1 %751 }
  0xa4   :  { %2013 = vmatmul.mubr.msk.bf16.gmra.mrb[48].mxu1 %vm954_vm1, %v2073_v26  ;;  %v2714_v10 = vpop.permute.xlu0 %836 }
  0xa5   :  { %2016 = vmatprep.mubr.msk.bf16.mxu1 %vm954_vm1, %v2074_v27  ;;  %v2716_v11 = vpop.permute.xlu1 %841 }
  0xa8   :  { %v757_v16 = vpop.permute.xlu0 %756 }
  0xa9   :  { %v762_v17 = vpop.permute.xlu1 %761 }
  0xac   :  { %2017 = vmatmul.mubr.msk.bf16.gmra.mrb[52].mxu1 %vm954_vm1, %v2075_v28  ;;  %v2730_v20 = vpop.permute.xlu0 %846 }
  0xad   :  { %2020 = vmatprep.mubr.msk.bf16.mxu1 %vm954_vm1, %v2076_v29  ;;  %v2736_v23 = vpop.permute.xlu1 %851 }
  0xb0   :  { %v767_v24 = vpop.permute.xlu0 %766 }
  0xb1   :  { %v772_v28 = vpop.permute.xlu1 %771 }
  0xb4   :  { %2021 = vmatmul.mubr.msk.bf16.gmra.mrb[56].mxu1 %vm954_vm1, %v2077_v30 }
  0xb5   :  { %2024 = vmatprep.mubr.msk.bf16.mxu1 %vm954_vm1, %v2078_v31 }
  0xbc   :  { %2025 = vmatmul.mubr.msk.bf16.gmra.mrb[60].mxu1 %vm954_vm1, %v2079_v32 }
 0x117   :  { %v2649_v35 = vpop.f32.mrb[0].mxu1 }
 0x118   :  { %v2651_v36 = vpop.f32.mrb[1].mxu1 }
 0x119   :  { %v2653_v37 = vpop.f32.mrb[2].mxu1 }
 0x11a   :  { %v2655_v38 = vpop.f32.mrb[3].mxu1 }
 0x11f   :  { %v2662_v42 = vpop.f32.mrb[4].mxu1 }
 0x120   :  { %v2664_v43 = vpop.f32.mrb[5].mxu1 }
 0x121   :  { %v2668_v45 = vpop.f32.mrb[6].mxu1 }
 0x122   :  { %v2670_v46 = vpop.f32.mrb[7].mxu1 }
 0x127   :  { %v2674_v49 = vpop.f32.mrb[8].mxu1 }
 0x128   :  { %v2676_v50 = vpop.f32.mrb[9].mxu1 }
 0x129   :  { %v2678_v52 = vpop.f32.mrb[10].mxu1 }
 0x12a   :  { %v2680_v53 = vpop.f32.mrb[11].mxu1 }
 0x12f   :  { %v2686_v56 = vpop.f32.mrb[12].mxu1 }
 0x130   :  { %v2688_v57 = vpop.f32.mrb[13].mxu1 }
 0x131   :  { %v2690_v58 = vpop.f32.mrb[14].mxu1 }
 0x132   :  { %v2692_v59 = vpop.f32.mrb[15].mxu1 }
 0x137   :  { %v2694_v62 = vpop.f32.mrb[16].mxu1 }
 0x138   :  { %v2696_v63 = vpop.f32.mrb[17].mxu1 }
 0x139   :  { %v2700_v1 = vpop.f32.mrb[18].mxu1 }
 0x13a   :  { %2935 = vst [vmem:[#allocation6_spill] sm:$0xff] %v2700_v1  ;;  %v2702_v2 = vpop.f32.mrb[19].mxu1 }
 0x13f   :  { %v2706_v5 = vpop.f32.mrb[20].mxu1 }
 0x140   :  { %2936 = vst [vmem:[#allocation7_spill] sm:$0xff] %v2706_v5  ;;  %v2708_v6 = vpop.f32.mrb[21].mxu1 }
 0x141   :  { %2937 = vst [vmem:[#allocation8_spill] sm:$0xff] %v2708_v6  ;;  %v2710_v8 = vpop.f32.mrb[22].mxu1 }
 0x142   :  { %2938 = vst [vmem:[#allocation9_spill] sm:$0xff] %v2710_v8  ;;  %v2712_v9 = vpop.f32.mrb[23].mxu1 }
 0x143   :  { %2939 = vst [vmem:[#allocation10_spill] sm:$0xff] %v2712_v9 }
 0x147   :  { %v2718_v12 = vpop.f32.mrb[24].mxu1 }
 0x148   :  { %2940 = vst [vmem:[#allocation11_spill] sm:$0xff] %v2718_v12  ;;  %v2720_v13 = vpop.f32.mrb[25].mxu1 }
 0x149   :  { %2941 = vst [vmem:[#allocation12_spill] sm:$0xff] %v2720_v13  ;;  %v2722_v14 = vpop.f32.mrb[26].mxu1 }
 0x14a   :  { %2942 = vst [vmem:[#allocation13_spill] sm:$0xff] %v2722_v14  ;;  %v2724_v15 = vpop.f32.mrb[27].mxu1  ;;  %v2738_v14 = vpop.permute.xlu0 %856 }
 0x14b   :  { %2943 = vst [vmem:[#allocation14_spill] sm:$0xff] %v2724_v15 }
 0x14f   :  { %v2726_v18 = vpop.f32.mrb[28].mxu1 }
 0x150   :  { %2944 = vst [vmem:[#allocation15_spill] sm:$0xff] %v2726_v18  ;;  %v2728_v19 = vpop.f32.mrb[29].mxu1 }
 0x151   :  { %2945 = vst [vmem:[#allocation16_spill] sm:$0xff] %v2728_v19  ;;  %v2732_v21 = vpop.f32.mrb[30].mxu1 }
 0x152   :  { %2946 = vst [vmem:[#allocation17_spill] sm:$0xff] %v2732_v21  ;;  %v2734_v22 = vpop.f32.mrb[31].mxu1 }
 0x153   :  { %2947 = vst [vmem:[#allocation18_spill] sm:$0xff] %v2734_v22  ;;  %v2742_v22 = vpop.permute.xlu1 %861 }
 0x157   :  { %v1998_v25 = vpop.f32.mrb[32].mxu1  ;;  %v782_v5 = vpop.permute.xlu1 %781 }
 0x158   :  { %v1070_v26 = vadd.f32 %v1998_v25, %v727_v48  ;;  %v1061_v27 = vpop.f32.mrb[33].mxu1 }
 0x159   :  { %v1062_v29 = vadd.f32 %v1061_v27, %v717_v34  ;;  %v1999_v30 = vpop.f32.mrb[34].mxu1 }
 0x15a   :  { %v1073_v31 = vadd.f32 %v1999_v30, %v732_v51  ;;  %v1064_v32 = vpop.f32.mrb[35].mxu1  ;;  %v1190_v18 = vmax.f32 %v1070_v26, 0.0 }
 0x15b   :  { %v1065_v41 = vadd.f32 %v1064_v32, %v722_v40  ;;  %v1188_v12 = vmax.f32 %v1062_v29, 0.0  ;;  %v777_v40 = vpop.permute.xlu0 %776 }
 0x15c   :  { %v1191_v19 = vmax.f32 %v1073_v31, 0.0 }
 0x15d   :  { %v1189_v21 = vmax.f32 %v1065_v41, 0.0 }
 0x15e   :  { %v2740_v15 = vpack.c.bf16 %v1191_v19, %v1190_v18 }
 0x15f   :  { %v2002_v13 = vpop.f32.mrb[36].mxu1  ;;  %v2744_v8 = vpack.c.bf16 %v1189_v21, %v1188_v12 }
 0x160   :  { %v1086_v48 = vadd.f32 %v2002_v13, %v747_v4  ;;  %v1077_v25 = vpop.f32.mrb[37].mxu1  ;;  %v2750_v4 = vpop.permute.xlu0 %866 }
 0x161   :  { %v1078_v34 = vadd.f32 %v1077_v25, %v737_v60  ;;  %v2003_v27 = vpop.f32.mrb[38].mxu1 }
 0x162   :  { %v1089_v51 = vadd.f32 %v2003_v27, %v752_v7  ;;  %v1080_v30 = vpop.f32.mrb[39].mxu1  ;;  %v1194_v31 = vmax.f32 %v1086_v48, 0.0  ;;  %v2752_v27 = vpop.permute.xlu1 %871 }
 0x163   :  { %v1081_v26 = vadd.f32 %v1080_v30, %v742_v61  ;;  %v1192_v29 = vmax.f32 %v1078_v34, 0.0 }
 0x164   :  { %v1195_v32 = vmax.f32 %v1089_v51, 0.0 }
 0x165   :  { %v1193_v41 = vmax.f32 %v1081_v26, 0.0 }
 0x166   :  { %v2746_v18 = vpack.c.bf16 %v1195_v32, %v1194_v31  ;;  %v787_v31 = vpop.permute.xlu0 %786 }
 0x167   :  { %v2748_v19 = vpack.c.bf16 %v1193_v41, %v1192_v29  ;;  %v2006_v9 = vpop.f32.mrb[40].mxu1  ;;  %v792_v41 = vpop.permute.xlu1 %791 }
 0x168   :  { %v1102_v12 = vadd.f32 %v2006_v9, %v767_v24  ;;  %v1093_v21 = vpop.f32.mrb[41].mxu1 }
 0x169   :  { %v1094_v60 = vadd.f32 %v1093_v21, %v757_v16  ;;  %v2007_v13 = vpop.f32.mrb[42].mxu1 }
 0x16a   :  { %v1105_v7 = vadd.f32 %v2007_v13, %v772_v28  ;;  %v1096_v25 = vpop.f32.mrb[43].mxu1  ;;  %v1198_v48 = vmax.f32 %v1102_v12, 0.0 }
 0x16b   :  { %v1097_v61 = vadd.f32 %v1096_v25, %v762_v17  ;;  %v1196_v34 = vmax.f32 %v1094_v60, 0.0 }
 0x16c   :  { %v1199_v51 = vmax.f32 %v1105_v7, 0.0 }
 0x16d   :  { %v1197_v30 = vmax.f32 %v1097_v61, 0.0 }
 0x16e   :  { %v2754_v26 = vpack.c.bf16 %v1199_v51, %v1198_v48 }
 0x16f   :  { %v2756_v32 = vpack.c.bf16 %v1197_v30, %v1196_v34  ;;  %v2010_v9 = vpop.f32.mrb[44].mxu1 }
 0x170   :  { %v1118_v24 = vadd.f32 %v2010_v9, %v787_v31  ;;  %v1109_v29 = vpop.f32.mrb[45].mxu1 }
 0x171   :  { %v1110_v16 = vadd.f32 %v1109_v29, %v777_v40  ;;  %v2011_v21 = vpop.f32.mrb[46].mxu1 }
 0x172   :  { %v1121_v28 = vadd.f32 %v2011_v21, %v792_v41  ;;  %v1112_v13 = vpop.f32.mrb[47].mxu1  ;;  %v1202_v1 = vmax.f32 %v1118_v24, 0.0 }
 0x173   :  { %v1113_v6 = vadd.f32 %v1112_v13, %v782_v5  ;;  %v1200_v12 = vmax.f32 %v1110_v16, 0.0 }
 0x174   :  { %v1203_v17 = vmax.f32 %v1121_v28, 0.0 }
 0x175   :  { %v1201_v7 = vmax.f32 %v1113_v6, 0.0 }
 0x176   :  { %v2758_v60 = vpack.c.bf16 %v1203_v17, %v1202_v1 }
 0x177   :  { %v2760_v25 = vpack.c.bf16 %v1201_v7, %v1200_v12  ;;  %v2014_v61 = vpop.f32.mrb[48].mxu1 }
 0x178   :  { %v1134_v48 = vadd.f32 %v2014_v61, %v2666_v44  ;;  %v1125_v51 = vpop.f32.mrb[49].mxu1 }
 0x179   :  { %v1126_v34 = vadd.f32 %v1125_v51, %v2647_v33  ;;  %v2015_v30 = vpop.f32.mrb[50].mxu1 }
 0x17a   :  { %v1137_v40 = vadd.f32 %v2015_v30, %v2672_v47  ;;  %v1128_v31 = vpop.f32.mrb[51].mxu1  ;;  %v1206_v9 = vmax.f32 %v1134_v48, 0.0 }
 0x17b   :  { %v1129_v5 = vadd.f32 %v1128_v31, %v2657_v39  ;;  %v1204_v29 = vmax.f32 %v1126_v34, 0.0 }
 0x17c   :  { %v1207_v24 = vmax.f32 %v1137_v40, 0.0 }
 0x17d   :  { %v1205_v6 = vmax.f32 %v1129_v5, 0.0 }
 0x17e   :  { %v1261_v1 = vpack.c.bf16 %v1207_v24, %v1206_v9 }
 0x17f   :  { %v2018_v41 = vpop.f32.mrb[52].mxu1  ;;  %v1260_v16 = vpack.c.bf16 %v1205_v6, %v1204_v29 }
 0x180   :  { %v1150_v21 = vadd.f32 %v2018_v41, %v2698_v0  ;;  %v1141_v28 = vpop.f32.mrb[53].mxu1 }
 0x181   :  { %v1142_v44 = vadd.f32 %v1141_v28, %v2682_v54  ;;  %v2019_v13 = vpop.f32.mrb[54].mxu1  ;;  %1820 = vmatprep.subr.bf16.mxu0 %v1260_v16 }
 0x182   :  { %v1153_v33 = vadd.f32 %v2019_v13, %v2704_v3  ;;  %v1144_v47 = vpop.f32.mrb[55].mxu1  ;;  %1821 = vmatpush3.bf16.msra.mxu0 %v2744_v8  ;;  %v1210_v17 = vmax.f32 %v1150_v21, 0.0  ;;  %v2092_v13 = vld [vmem:[%s2932_s6 + $0x44] ss:$8 sps:$4 sm:$0xff]  }
 0x183   :  { %v1145_v39 = vadd.f32 %v1144_v47, %v2684_v55  ;;  %1822 = vmatprep.subr.bf16.mxu0 %v1261_v1  ;;  %v1208_v7 = vmax.f32 %v1142_v44, 0.0  ;;  %v2095_v47 = vld [vmem:[%s2932_s6 + $0x54] ss:$8 sps:$4 sm:$0xff]  }
 0x184   :  { %v1211_v12 = vmax.f32 %v1153_v33, 0.0  ;;  %v2094_v33 = vld [vmem:[%s2932_s6 + $0x40] ss:$8 sps:$4 sm:$0xff]  }
 0x185   :  { %v1209_v61 = vmax.f32 %v1145_v39, 0.0  ;;  %v2097_v39 = vld [vmem:[%s2932_s6 + $0x50] ss:$8 sps:$4 sm:$0xff]  }
 0x186   :  { %v1263_v48 = vpack.c.bf16 %v1211_v12, %v1210_v17  ;;  %1823 = vmatpush3.bf16.msra.mxu0 %v2740_v15  ;;  %v2098_v17 = vld [vmem:[%s2932_s6 + $0x64] ss:$8 sps:$4 sm:$0xff]   ;;  %v2100_v12 = vld [vmem:[%s2932_s6 + $0x60] ss:$8 sps:$4 sm:$0xff]  }
 0x187   :  { %v1262_v0 = vpack.c.bf16 %v1209_v61, %v1208_v7  ;;  %v2022_v51 = vpop.f32.mrb[56].mxu1  ;;  %v2101_v7 = vld [vmem:[%s2932_s6 + $0x74] ss:$8 sps:$4 sm:$0xff]   ;;  %v2103_v61 = vld [vmem:[%s2932_s6 + $0x70] ss:$8 sps:$4 sm:$0xff]  }
 0x188   :  { %v1166_v54 = vadd.f32 %v2022_v51, %v2730_v20  ;;  %v1157_v34 = vpop.f32.mrb[57].mxu1  ;;  %v2107_v51 = vld [vmem:[%s2932_s6 + $0x94] ss:$8 sps:$4 sm:$0xff]  }
 0x189   :  { %v1158_v3 = vadd.f32 %v1157_v34, %v2714_v10  ;;  %v2023_v30 = vpop.f32.mrb[58].mxu1  ;;  %1824 = vmatprep.subr.bf16.mxu0 %v1262_v0  ;;  %v2106_v0 = vld [vmem:[%s2932_s6 + $0x80] ss:$8 sps:$4 sm:$0xff]   ;;  %v2110_v34 = vld [vmem:[%s2932_s6 + $0xa4] ss:$8 sps:$4 sm:$0xff]  }
 0x18a   :  { %v1169_v8 = vadd.f32 %v2023_v30, %v2736_v23  ;;  %v1160_v55 = vpop.f32.mrb[59].mxu1  ;;  %1825 = vmatpush3.bf16.msra.mxu0 %v2748_v19  ;;  %v1214_v31 = vmax.f32 %v1166_v54, 0.0  ;;  %v2109_v54 = vld [vmem:[%s2932_s6 + $0x90] ss:$8 sps:$4 sm:$0xff]   ;;  %v2113_v30 = vld [vmem:[%s2932_s6 + $0xb4] ss:$8 sps:$4 sm:$0xff]  }
 0x18b   :  { %v1161_v40 = vadd.f32 %v1160_v55, %v2716_v11  ;;  %1826 = vmatprep.subr.bf16.mxu0 %v1263_v48  ;;  %v1212_v15 = vmax.f32 %v1158_v3, 0.0  ;;  %v2104_v48 = vld [vmem:[%s2932_s6 + $0x84] ss:$8 sps:$4 sm:$0xff]   ;;  %v2112_v3 = vld [vmem:[%s2932_s6 + $0xa0] ss:$8 sps:$4 sm:$0xff]  }
 0x18c   :  { %v1215_v5 = vmax.f32 %v1169_v8, 0.0  ;;  %v2115_v8 = vld [vmem:[%s2932_s6 + $0xb0] ss:$8 sps:$4 sm:$0xff]   ;;  %v2116_v55 = vld [vmem:[%s2932_s6 + $0xc4] ss:$8 sps:$4 sm:$0xff]  }
 0x18d   :  { %v1213_v9 = vmax.f32 %v1161_v40, 0.0  ;;  %v2118_v40 = vld [vmem:[%s2932_s6 + $0xc0] ss:$8 sps:$4 sm:$0xff]  }
 0x18e   :  { %v1265_v24 = vpack.c.bf16 %v1215_v5, %v1214_v31  ;;  %1827 = vmatpush3.bf16.msra.mxu0 %v2746_v18  ;;  %v2119_v31 = vld [vmem:[%s2932_s6 + $0xd4] ss:$8 sps:$4 sm:$0xff]   ;;  %v2121_v5 = vld [vmem:[%s2932_s6 + $0xd0] ss:$8 sps:$4 sm:$0xff]  }
 0x18f   :  { %v1264_v20 = vpack.c.bf16 %v1213_v9, %v1212_v15  ;;  %v2026_v29 = vpop.f32.mrb[60].mxu1  ;;  %v2122_v15 = vld [vmem:[%s2932_s6 + $0xe4] ss:$8 sps:$4 sm:$0xff]   ;;  %v2124_v9 = vld [vmem:[%s2932_s6 + $0xe0] ss:$8 sps:$4 sm:$0xff]  }
 0x190   :  { %v1182_v10 = vadd.f32 %v2026_v29, %v2750_v4  ;;  %v1173_v6 = vpop.f32.mrb[61].mxu1  ;;  %v179_v29 = vpop.permute.xlu0 %178 }
 0x191   :  { %v1174_v23 = vadd.f32 %v1173_v6, %v2738_v14  ;;  %v2027_v1 = vpop.f32.mrb[62].mxu1  ;;  %1828 = vmatprep.subr.bf16.mxu0 %v1264_v20  ;;  %v2080_v14 = vld [vmem:[%s2932_s6] ss:$8 sps:$4 sm:$0xff]   ;;  %v2127_v20 = vld [vmem:[%s2932_s6 + $0xf0] ss:$8 sps:$4 sm:$0xff]   ;;  %v184_v6 = vpop.permute.xlu1 %183 }
 0x192   :  { %v1185_v19 = vadd.f32 %v2027_v1, %v2752_v27  ;;  %v1176_v11 = vpop.f32.mrb[63].mxu1  ;;  %1829 = vmatpush3.bf16.msra.mxu0 %v2756_v32  ;;  %v1218_v16 = vmax.f32 %v1182_v10, 0.0  ;;  %v2085_v27 = vld [vmem:[%s2932_s6 + $0x10] ss:$8 sps:$4 sm:$0xff]   ;;  %v2088_v32 = vld [vmem:[%s2932_s6 + $0x20] ss:$8 sps:$4 sm:$0xff]   ;;  %v524_v10 = vadd.f32 %v2651_v36, %v179_v29 }
 0x193   :  { %v1177_v41 = vadd.f32 %v1176_v11, %v2742_v22  ;;  %1830 = vmatprep.subr.bf16.mxu0 %v1265_v24  ;;  %v1216_v18 = vmax.f32 %v1174_v23, 0.0  ;;  %v2083_v22 = vld [vmem:[%s2932_s6 + $0x14] ss:$8 sps:$4 sm:$0xff]   ;;  %v527_v23 = vadd.f32 %v2655_v38, %v184_v6 }
 0x194   :  { %v1219_v21 = vmax.f32 %v1185_v19, 0.0  ;;  %v2125_v24 = vld [vmem:[%s2932_s6 + $0xf4] ss:$8 sps:$4 sm:$0xff]   ;;  %v650_v11 = vmax.f32 %v524_v10, 0.0 }
 0x195   :  { %v1217_v28 = vmax.f32 %v1177_v41, 0.0 }
 0x196   :  { %v1267_v44 = vpack.c.bf16 %v1219_v21, %v1218_v16  ;;  %1831 = vmatpush3.bf16.msra.mxu0 %v2754_v26  ;;  %v2086_v26 = vld [vmem:[%s2932_s6 + $0x24] ss:$8 sps:$4 sm:$0xff]   ;;  %v189_v21 = vpop.permute.xlu0 %188 }
 0x197   :  { %v1266_v4 = vpack.c.bf16 %v1217_v28, %v1216_v18  ;;  %v651_v28 = vmax.f32 %v527_v23, 0.0 }
 0x199   :  { %1832 = vmatprep.subr.bf16.mxu0 %v1266_v4 }
 0x19a   :  { %1833 = vmatpush3.bf16.msra.mxu0 %v2760_v25  ;;  %v2091_v25 = vld [vmem:[%s2932_s6 + $0x30] ss:$8 sps:$4 sm:$0xff]  }
 0x19b   :  { %1834 = vmatprep.subr.bf16.mxu0 %v1267_v44 }
 0x19e   :  { %1835 = vmatpush3.bf16.msra.mxu0 %v2758_v60  ;;  %v2089_v60 = vld [vmem:[%s2932_s6 + $0x34] ss:$8 sps:$4 sm:$0xff]  }
 0x1a1   :  { %1461 = vmatmul.mubr.bf16.vlgmr.msra.gmra.mrb[0].mxu0 %v2080_v14  ;;  %v194_v14 = vpop.permute.xlu1 %193 }
 0x1a2   :  { %1468 = vmatprep.mubr.bf16.mxu0 %v2083_v22  ;;  %v532_v22 = vadd.f32 %v2649_v35, %v189_v21 }
 0x1a4   :  { %v652_v38 = vmax.f32 %v532_v22, 0.0 }
 0x1a9   :  { %1469 = vmatmul.mubr.bf16.gmra.mrb[4].mxu0 %v2085_v27 }
 0x1aa   :  { %1476 = vmatprep.mubr.bf16.mxu0 %v2086_v26  ;;  %v535_v26 = vadd.f32 %v2653_v37, %v194_v14 }
 0x1b1   :  { %1477 = vmatmul.mubr.bf16.gmra.mrb[8].mxu0 %v2088_v32 }
 0x1b2   :  { %1484 = vmatprep.mubr.bf16.mxu0 %v2089_v60 }
 0x1b9   :  { %1485 = vmatmul.mubr.bf16.gmra.mrb[12].mxu0 %v2091_v25 }
 0x1ba   :  { %1492 = vmatprep.mubr.bf16.mxu0 %v2092_v13 }
 0x1c1   :  { %1493 = vmatmul.mubr.bf16.gmra.mrb[16].mxu0 %v2094_v33 }
 0x1c2   :  { %1500 = vmatprep.mubr.bf16.mxu0 %v2095_v47  ;;  %v653_v47 = vmax.f32 %v535_v26, 0.0 }
 0x1c9   :  { %1501 = vmatmul.mubr.bf16.gmra.mrb[20].mxu0 %v2097_v39 }
 0x1ca   :  { %1508 = vmatprep.mubr.bf16.mxu0 %v2098_v17 }
 0x1d1   :  { %1509 = vmatmul.mubr.bf16.gmra.mrb[24].mxu0 %v2100_v12  ;;  %v199_v12 = vpop.permute.xlu0 %198 }
 0x1d2   :  { %1516 = vmatprep.mubr.bf16.mxu0 %v2101_v7  ;;  %v540_v7 = vadd.f32 %v2664_v43, %v199_v12 }
 0x1d9   :  { %1517 = vmatmul.mubr.bf16.gmra.mrb[28].mxu0 %v2103_v61 }
 0x1da   :  { %1524 = vmatprep.mubr.bf16.mxu0 %v2104_v48 }
 0x1e1   :  { %1525 = vmatmul.mubr.bf16.gmra.mrb[32].mxu0 %v2106_v0  ;;  %v204_v0 = vpop.permute.xlu1 %203 }
 0x1e2   :  { %1532 = vmatprep.mubr.bf16.mxu0 %v2107_v51  ;;  %v543_v35 = vadd.f32 %v2670_v46, %v204_v0 }
 0x1e9   :  { %1533 = vmatmul.mubr.bf16.gmra.mrb[36].mxu0 %v2109_v54 }
 0x1ea   :  { %1540 = vmatprep.mubr.bf16.mxu0 %v2110_v34  ;;  %v654_v34 = vmax.f32 %v540_v7, 0.0 }
 0x1f1   :  { %1541 = vmatmul.mubr.bf16.gmra.mrb[40].mxu0 %v2112_v3 }
 0x1f2   :  { %1548 = vmatprep.mubr.bf16.mxu0 %v2113_v30 }
 0x1f9   :  { %1549 = vmatmul.mubr.bf16.gmra.mrb[44].mxu0 %v2115_v8  ;;  %v209_v8 = vpop.permute.xlu0 %208 }
 0x1fa   :  { %1556 = vmatprep.mubr.bf16.mxu0 %v2116_v55 }
 0x1fd   :  { %v219_v21 = vpop.permute.xlu0 %218 }
 0x201   :  { %1557 = vmatmul.mubr.bf16.gmra.mrb[48].mxu0 %v2118_v40  ;;  %v655_v40 = vmax.f32 %v543_v35, 0.0 }
 0x202   :  { %1564 = vmatprep.mubr.bf16.mxu0 %v2119_v31 }
 0x209   :  { %1565 = vmatmul.mubr.bf16.gmra.mrb[52].mxu0 %v2121_v5 }
 0x20a   :  { %1572 = vmatprep.mubr.bf16.mxu0 %v2122_v15  ;;  %v214_v15 = vpop.permute.xlu1 %213 }
 0x211   :  { %1573 = vmatmul.mubr.bf16.gmra.mrb[56].mxu0 %v2124_v9  ;;  %v548_v9 = vadd.f32 %v2662_v42, %v209_v8  ;;  %v224_v42 = vpop.permute.xlu1 %223 }
 0x212   :  { %1580 = vmatprep.mubr.bf16.mxu0 %v2125_v24 }
 0x213   :  { %v656_v6 = vmax.f32 %v548_v9, 0.0 }
 0x219   :  { %1581 = vmatmul.mubr.bf16.gmra.mrb[60].mxu0 %v2127_v20  ;;  %v551_v20 = vadd.f32 %v2668_v45, %v214_v15 }
 0x274   :  { %v1836_v1 = vpop.f32.mrb[0].mxu0 }
 0x275   :  { %v1837_v19 = vpop.f32.mrb[1].mxu0 }
 0x276   :  { %v1838_v41 = vadd.f32 %v1837_v19, %v1836_v1  ;;  %v1839_v16 = vpop.f32.mrb[2].mxu0 }
 0x277   :  { %v1840_v18 = vpop.f32.mrb[3].mxu0 }
 0x278   :  { %v1589_v44 = vmul.f32 %v1838_v41, %v650_v11  ;;  %v1841_v4 = vadd.f32 %v1840_v18, %v1839_v16  ;;  %v657_v11 = vmax.f32 %v551_v20, 0.0  ;;  %v556_v18 = vadd.f32 %v2676_v50, %v219_v21 }
 0x27a   :  { %v1590_v27 = vmul.f32 %v1841_v4, %v651_v28  ;;  %v559_v4 = vadd.f32 %v2680_v53, %v224_v42 }
 0x27c   :  { %v1621_v36 = vadd.f32 %v1590_v27, %v1589_v44  ;;  %v1842_v32 = vpop.f32.mrb[4].mxu0  ;;  %v658_v27 = vmax.f32 %v556_v18, 0.0 }
 0x27d   :  { %v1843_v60 = vpop.f32.mrb[5].mxu0 }
 0x27e   :  { %v1844_v25 = vadd.f32 %v1843_v60, %v1842_v32  ;;  %v1845_v13 = vpop.f32.mrb[6].mxu0  ;;  %v229_v32 = vpop.permute.xlu0 %228 }
 0x27f   :  { %v1846_v33 = vpop.f32.mrb[7].mxu0 }
 0x280   :  { %v1591_v39 = vmul.f32 %v1844_v25, %v652_v38  ;;  %v1847_v17 = vadd.f32 %v1846_v33, %v1845_v13  ;;  %v659_v38 = vmax.f32 %v559_v4, 0.0  ;;  %v234_v33 = vpop.permute.xlu1 %233 }
 0x282   :  { %v1622_v61 = vadd.f32 %v1621_v36, %v1591_v39  ;;  %v1592_v48 = vmul.f32 %v1847_v17, %v653_v47  ;;  %v564_v47 = vadd.f32 %v2674_v49, %v229_v32  ;;  %v567_v17 = vadd.f32 %v2678_v52, %v234_v33 }
 0x284   :  { %v1623_v51 = vadd.f32 %v1622_v61, %v1592_v48  ;;  %v1848_v37 = vpop.f32.mrb[8].mxu0  ;;  %v660_v61 = vmax.f32 %v564_v47, 0.0  ;;  %v244_v49 = vpop.permute.xlu1 %243 }
 0x285   :  { %v1849_v54 = vpop.f32.mrb[9].mxu0 }
 0x286   :  { %v1850_v3 = vadd.f32 %v1849_v54, %v1848_v37  ;;  %v1851_v30 = vpop.f32.mrb[10].mxu0 }
 0x287   :  { %v1852_v55 = vpop.f32.mrb[11].mxu0 }
 0x288   :  { %v1593_v31 = vmul.f32 %v1850_v3, %v654_v34  ;;  %v1853_v5 = vadd.f32 %v1852_v55, %v1851_v30  ;;  %v239_v34 = vpop.permute.xlu0 %238  ;;  %v575_v55 = vadd.f32 %v2692_v59, %v244_v49 }
 0x289   :  { %v572_v3 = vadd.f32 %v2688_v57, %v239_v34 }
 0x28a   :  { %v1624_v43 = vadd.f32 %v1623_v51, %v1593_v31  ;;  %v1594_v24 = vmul.f32 %v1853_v5, %v655_v40  ;;  %v661_v51 = vmax.f32 %v567_v17, 0.0  ;;  %v663_v20 = vmax.f32 %v575_v55, 0.0 }
 0x28b   :  { %v662_v5 = vmax.f32 %v572_v3, 0.0 }
 0x28c   :  { %v1625_v29 = vadd.f32 %v1624_v43, %v1594_v24  ;;  %v1854_v46 = vpop.f32.mrb[12].mxu0  ;;  %v249_v43 = vpop.permute.xlu0 %248 }
 0x28d   :  { %v1855_v10 = vpop.f32.mrb[13].mxu0 }
 0x28e   :  { %v1856_v23 = vadd.f32 %v1855_v10, %v1854_v46  ;;  %v1857_v1 = vpop.f32.mrb[14].mxu0  ;;  %v254_v10 = vpop.permute.xlu1 %253 }
 0x28f   :  { %v1858_v19 = vpop.f32.mrb[15].mxu0 }
 0x290   :  { %v1595_v41 = vmul.f32 %v1856_v23, %v656_v6  ;;  %v1859_v16 = vadd.f32 %v1858_v19, %v1857_v1  ;;  %v580_v6 = vadd.f32 %v2686_v56, %v249_v43  ;;  %v583_v1 = vadd.f32 %v2690_v58, %v254_v10  ;;  %v259_v4 = vpop.permute.xlu0 %258 }
 0x292   :  { %v1626_v28 = vadd.f32 %v1625_v29, %v1595_v41  ;;  %v1596_v44 = vmul.f32 %v1859_v16, %v657_v11  ;;  %v664_v41 = vmax.f32 %v580_v6, 0.0  ;;  %v264_v56 = vpop.permute.xlu1 %263 }
 0x294   :  { %v1627_v14 = vadd.f32 %v1626_v28, %v1596_v44  ;;  %v1860_v45 = vpop.f32.mrb[16].mxu0  ;;  %v665_v28 = vmax.f32 %v583_v1, 0.0  ;;  %v2951_v1 = vld [vmem:[#allocation7_spill] sm:$0xff] }
 0x295   :  { %v1861_v22 = vpop.f32.mrb[17].mxu0 }
 0x296   :  { %v1862_v26 = vadd.f32 %v1861_v22, %v1860_v45  ;;  %v1863_v36 = vpop.f32.mrb[18].mxu0 }
 0x297   :  { %v1864_v60 = vpop.f32.mrb[19].mxu0 }
 0x298   :  { %v1597_v25 = vmul.f32 %v1862_v26, %v658_v27  ;;  %v1865_v13 = vadd.f32 %v1864_v60, %v1863_v36  ;;  %v591_v27 = vadd.f32 %v2702_v2, %v264_v56 }
 0x29a   :  { %v1628_v50 = vadd.f32 %v1627_v14, %v1597_v25  ;;  %v1598_v39 = vmul.f32 %v1865_v13, %v659_v38  ;;  %v588_v14 = vadd.f32 %v2696_v63, %v259_v4  ;;  %v269_v25 = vpop.permute.xlu0 %268  ;;  %v667_v33 = vmax.f32 %v591_v27, 0.0 }
 0x29b   :  { %v596_v17 = vadd.f32 %v2694_v62, %v269_v25 }
 0x29c   :  { %v1629_v12 = vadd.f32 %v1628_v50, %v1598_v39  ;;  %v1866_v53 = vpop.f32.mrb[20].mxu0  ;;  %v666_v32 = vmax.f32 %v588_v14, 0.0  ;;  %v274_v39 = vpop.permute.xlu1 %273 }
 0x29d   :  { %v1867_v7 = vpop.f32.mrb[21].mxu0 }
 0x29e   :  { %v1868_v48 = vadd.f32 %v1867_v7, %v1866_v53  ;;  %v1869_v0 = vpop.f32.mrb[22].mxu0  ;;  %v2948_v53 = vld [vmem:[#allocation6_spill] sm:$0xff] }
 0x29f   :  { %v1870_v35 = vpop.f32.mrb[23].mxu0  ;;  %v599_v7 = vadd.f32 %v2948_v53, %v274_v39 }
 0x2a0   :  { %v1599_v37 = vmul.f32 %v1868_v48, %v660_v61  ;;  %v1871_v54 = vadd.f32 %v1870_v35, %v1869_v0  ;;  %v668_v0 = vmax.f32 %v596_v17, 0.0  ;;  %v284_v62 = vpop.permute.xlu1 %283 }
 0x2a2   :  { %v1630_v30 = vadd.f32 %v1629_v12, %v1599_v37  ;;  %v1600_v8 = vmul.f32 %v1871_v54, %v661_v51  ;;  %v669_v54 = vmax.f32 %v599_v7, 0.0 }
 0x2a4   :  { %v1631_v40 = vadd.f32 %v1630_v30, %v1600_v8  ;;  %v1872_v52 = vpop.f32.mrb[24].mxu0  ;;  %v279_v30 = vpop.permute.xlu0 %278  ;;  %v2949_v8 = vld [vmem:[#allocation8_spill] sm:$0xff] }
 0x2a5   :  { %v1873_v31 = vpop.f32.mrb[25].mxu0  ;;  %v604_v49 = vadd.f32 %v2949_v8, %v279_v30 }
 0x2a6   :  { %v1874_v15 = vadd.f32 %v1873_v31, %v1872_v52  ;;  %v1875_v9 = vpop.f32.mrb[26].mxu0  ;;  %v2950_v52 = vld [vmem:[#allocation10_spill] sm:$0xff] }
 0x2a7   :  { %v1876_v24 = vpop.f32.mrb[27].mxu0  ;;  %v607_v31 = vadd.f32 %v2950_v52, %v284_v62  ;;  %v670_v43 = vmax.f32 %v604_v49, 0.0 }
 0x2a8   :  { %v1601_v29 = vmul.f32 %v1874_v15, %v662_v5  ;;  %v1877_v46 = vadd.f32 %v1876_v24, %v1875_v9 }
 0x2a9   :  { %v671_v10 = vmax.f32 %v607_v31, 0.0 }
 0x2aa   :  { %v1632_v57 = vadd.f32 %v1631_v40, %v1601_v29  ;;  %v1602_v23 = vmul.f32 %v1877_v46, %v663_v20  ;;  %v289_v29 = vpop.permute.xlu0 %288 }
 0x2ac   :  { %v1633_v19 = vadd.f32 %v1632_v57, %v1602_v23  ;;  %v1878_v59 = vpop.f32.mrb[28].mxu0  ;;  %v294_v23 = vpop.permute.xlu1 %293 }
 0x2ad   :  { %v1879_v11 = vpop.f32.mrb[29].mxu0 }
 0x2ae   :  { %v1880_v16 = vadd.f32 %v1879_v11, %v1878_v59  ;;  %v1881_v21 = vpop.f32.mrb[30].mxu0  ;;  %v299_v27 = vpop.permute.xlu0 %298 }
 0x2af   :  { %v1882_v18 = vpop.f32.mrb[31].mxu0 }
 0x2b0   :  { %v1603_v44 = vmul.f32 %v1880_v16, %v664_v41  ;;  %v1883_v42 = vadd.f32 %v1882_v18, %v1881_v21  ;;  %v2952_v41 = vld [vmem:[#allocation9_spill] sm:$0xff] }
 0x2b1   :  { %v615_v16 = vadd.f32 %v2952_v41, %v294_v23 }
 0x2b2   :  { %v1634_v45 = vadd.f32 %v1633_v19, %v1603_v44  ;;  %v1604_v22 = vmul.f32 %v1883_v42, %v665_v28  ;;  %v612_v19 = vadd.f32 %v2951_v1, %v289_v29  ;;  %v2958_v29 = vld [vmem:[#allocation18_spill] sm:$0xff] }
 0x2b4   :  { %v1635_v26 = vadd.f32 %v1634_v45, %v1604_v22  ;;  %v1884_v58 = vpop.f32.mrb[32].mxu0  ;;  %v672_v44 = vmax.f32 %v612_v19, 0.0  ;;  %v673_v45 = vmax.f32 %v615_v16, 0.0 }
 0x2b5   :  { %v1885_v36 = vpop.f32.mrb[33].mxu0 }
 0x2b6   :  { %v1886_v60 = vadd.f32 %v1885_v36, %v1884_v58  ;;  %v1887_v38 = vpop.f32.mrb[34].mxu0 }
 0x2b7   :  { %v1888_v13 = vpop.f32.mrb[35].mxu0 }
 0x2b8   :  { %v1605_v47 = vmul.f32 %v1886_v60, %v666_v32  ;;  %v1889_v50 = vadd.f32 %v1888_v13, %v1887_v38  ;;  %v304_v60 = vpop.permute.xlu1 %303  ;;  %v2954_v38 = vld [vmem:[#allocation14_spill] sm:$0xff] }
 0x2b9   :  { %v623_v25 = vadd.f32 %v2954_v38, %v304_v60 }
 0x2ba   :  { %v1636_v63 = vadd.f32 %v1635_v26, %v1605_v47  ;;  %v1606_v12 = vmul.f32 %v1889_v50, %v667_v33  ;;  %v2953_v26 = vld [vmem:[#allocation12_spill] sm:$0xff] }
 0x2bb   :  { %v620_v58 = vadd.f32 %v2953_v26, %v299_v27  ;;  %v675_v53 = vmax.f32 %v623_v25, 0.0 }
 0x2bc   :  { %v1637_v61 = vadd.f32 %v1636_v63, %v1606_v12  ;;  %v1890_v2 = vpop.f32.mrb[36].mxu0  ;;  %v309_v63 = vpop.permute.xlu0 %308 }
 0x2bd   :  { %v1891_v48 = vpop.f32.mrb[37].mxu0  ;;  %v674_v50 = vmax.f32 %v620_v58, 0.0 }
 0x2be   :  { %v1892_v35 = vadd.f32 %v1891_v48, %v1890_v2  ;;  %v1893_v51 = vpop.f32.mrb[38].mxu0  ;;  %v314_v2 = vpop.permute.xlu1 %313  ;;  %v2955_v48 = vld [vmem:[#allocation11_spill] sm:$0xff] }
 0x2bf   :  { %v1894_v37 = vpop.f32.mrb[39].mxu0 }
 0x2c0   :  { %v1607_v34 = vmul.f32 %v1892_v35, %v668_v0  ;;  %v1895_v3 = vadd.f32 %v1894_v37, %v1893_v51  ;;  %v628_v0 = vadd.f32 %v2955_v48, %v309_v63  ;;  %v2956_v37 = vld [vmem:[#allocation13_spill] sm:$0xff] }
 0x2c2   :  { %v1638_v55 = vadd.f32 %v1637_v61, %v1607_v34  ;;  %v1608_v40 = vmul.f32 %v1895_v3, %v669_v54  ;;  %v631_v54 = vadd.f32 %v2956_v37, %v314_v2  ;;  %v676_v8 = vmax.f32 %v628_v0, 0.0 }
 0x2c4   :  { %v1639_v5 = vadd.f32 %v1638_v55, %v1608_v40  ;;  %v1896_v15 = vpop.f32.mrb[40].mxu0  ;;  %v677_v62 = vmax.f32 %v631_v54, 0.0 }
 0x2c5   :  { %v1897_v9 = vpop.f32.mrb[41].mxu0 }
 0x2c6   :  { %v1898_v24 = vadd.f32 %v1897_v9, %v1896_v15  ;;  %v1899_v20 = vpop.f32.mrb[42].mxu0  ;;  %v2957_v15 = vld [vmem:[#allocation16_spill] sm:$0xff] }
 0x2c7   :  { %v1900_v46 = vpop.f32.mrb[43].mxu0 }
 0x2c8   :  { %v1609_v6 = vmul.f32 %v1898_v24, %v670_v43  ;;  %v1901_v57 = vadd.f32 %v1900_v46, %v1899_v20  ;;  %v324_v20 = vpop.permute.xlu1 %323 }
 0x2c9   :  { %v639_v46 = vadd.f32 %v2958_v29, %v324_v20 }
 0x2ca   :  { %v1640_v59 = vadd.f32 %v1639_v5, %v1609_v6  ;;  %v1610_v11 = vmul.f32 %v1901_v57, %v671_v10  ;;  %v319_v5 = vpop.permute.xlu0 %318 }
 0x2cb   :  { %v636_v9 = vadd.f32 %v2957_v15, %v319_v5  ;;  %v679_v41 = vmax.f32 %v639_v46, 0.0 }
 0x2cc   :  { %v1641_v21 = vadd.f32 %v1640_v59, %v1610_v11  ;;  %v1902_v18 = vpop.f32.mrb[44].mxu0 }
 0x2cd   :  { %v1903_v28 = vpop.f32.mrb[45].mxu0  ;;  %v678_v23 = vmax.f32 %v636_v9, 0.0 }
 0x2ce   :  { %v1904_v42 = vadd.f32 %v1903_v28, %v1902_v18  ;;  %v1905_v4 = vpop.f32.mrb[46].mxu0  ;;  %v329_v59 = vpop.permute.xlu0 %328  ;;  %v2959_v28 = vld [vmem:[#allocation15_spill] sm:$0xff] }
 0x2cf   :  { %v1906_v14 = vpop.f32.mrb[47].mxu0  ;;  %v334_v18 = vpop.permute.xlu1 %333 }
 0x2d0   :  { %v1611_v22 = vmul.f32 %v1904_v42, %v672_v44  ;;  %v1907_v56 = vadd.f32 %v1906_v14, %v1905_v4  ;;  %v644_v44 = vadd.f32 %v2959_v28, %v329_v59  ;;  %v2960_v14 = vld [vmem:[#allocation17_spill] sm:$0xff] }
 0x2d2   :  { %v1642_v36 = vadd.f32 %v1641_v21, %v1611_v22  ;;  %v1612_v32 = vmul.f32 %v1907_v56, %v673_v45  ;;  %v647_v45 = vadd.f32 %v2960_v14, %v334_v18  ;;  %v680_v26 = vmax.f32 %v644_v44, 0.0 }
 0x2d4   :  { %v1643_v13 = vadd.f32 %v1642_v36, %v1612_v32  ;;  %v1908_v33 = vpop.f32.mrb[48].mxu0  ;;  %v681_v60 = vmax.f32 %v647_v45, 0.0 }
 0x2d5   :  { %v1909_v47 = vpop.f32.mrb[49].mxu0 }
 0x2d6   :  { %v1910_v39 = vadd.f32 %v1909_v47, %v1908_v33  ;;  %v1911_v17 = vpop.f32.mrb[50].mxu0 }
 0x2d7   :  { %v1912_v12 = vpop.f32.mrb[51].mxu0 }
 0x2d8   :  { %v1613_v7 = vmul.f32 %v1910_v39, %v674_v50  ;;  %v1913_v61 = vadd.f32 %v1912_v12, %v1911_v17 }
 0x2da   :  { %v1644_v35 = vadd.f32 %v1643_v13, %v1613_v7  ;;  %v1614_v51 = vmul.f32 %v1913_v61, %v675_v53  ;;  %v1659_v53 = vstv %s2933_s7 }
 0x2dc   :  { %v1645_v34 = vadd.f32 %v1644_v35, %v1614_v51  ;;  %v1914_v3 = vpop.f32.mrb[52].mxu0 }
 0x2dd   :  { %v1915_v30 = vpop.f32.mrb[53].mxu0 }
 0x2de   :  { %v1916_v49 = vadd.f32 %v1915_v30, %v1914_v3  ;;  %v1917_v55 = vpop.f32.mrb[54].mxu0 }
 0x2df   :  { %v1918_v40 = vpop.f32.mrb[55].mxu0 }
 0x2e0   :  { %v1615_v52 = vmul.f32 %v1916_v49, %v676_v8  ;;  %v1919_v31 = vadd.f32 %v1918_v40, %v1917_v55 }
 0x2e2   :  { %v1646_v43 = vadd.f32 %v1645_v34, %v1615_v52  ;;  %v1616_v24 = vmul.f32 %v1919_v31, %v677_v62 }
 0x2e4   :  { %v1647_v10 = vadd.f32 %v1646_v43, %v1616_v24  ;;  %v1920_v6 = vpop.f32.mrb[56].mxu0 }
 0x2e5   :  { %v1921_v57 = vpop.f32.mrb[57].mxu0 }
 0x2e6   :  { %v1922_v1 = vadd.f32 %v1921_v57, %v1920_v6  ;;  %v1923_v19 = vpop.f32.mrb[58].mxu0 }
 0x2e7   :  { %v1924_v11 = vpop.f32.mrb[59].mxu0 }
 0x2e8   :  { %v1617_v16 = vmul.f32 %v1922_v1, %v678_v23  ;;  %v1925_v21 = vadd.f32 %v1924_v11, %v1923_v19 }
 0x2ea   :  { %v1648_v42 = vadd.f32 %v1647_v10, %v1617_v16  ;;  %v1618_v4 = vmul.f32 %v1925_v21, %v679_v41 }
 0x2ec   :  { %v1649_v22 = vadd.f32 %v1648_v42, %v1618_v4  ;;  %v1926_v56 = vpop.f32.mrb[60].mxu0 }
 0x2ed   :  { %v1927_v27 = vpop.f32.mrb[61].mxu0 }
 0x2ee   :  { %v1928_v58 = vadd.f32 %v1927_v27, %v1926_v56  ;;  %v1929_v36 = vpop.f32.mrb[62].mxu0 }
 0x2ef   :  { %v1930_v32 = vpop.f32.mrb[63].mxu0 }
 0x2f0   :  { %v1619_v38 = vmul.f32 %v1928_v58, %v680_v26  ;;  %v1931_v25 = vadd.f32 %v1930_v32, %v1929_v36 }
 0x2f2   :  { %v1650_v13 = vadd.f32 %v1649_v22, %v1619_v38  ;;  %v1620_v33 = vmul.f32 %v1931_v25, %v681_v60 }
 0x2f4   :  { %v1651_v47 = vadd.f32 %v1650_v13, %v1620_v33 }
 0x2f6   :  { %v1652_v50 = vrot.slane %v1651_v47, 4 }
 0x2f8   :  { %v1653_v39 = vadd.f32 %v1652_v50, %v1651_v47 }
 0x2fa   :  { %v1654_v17 = vrot.slane %v1653_v39, 2 }
 0x2fc   :  { %v1655_v63 = vadd.f32 %v1654_v17, %v1653_v39 }
 0x2fe   :  { %v1656_v12 = vrot.slane %v1655_v63, 1 }
 0x300   :  { %v1657_v7 = vadd.f32 %v1656_v12, %v1655_v63 }
 0x302   :  { %v1660_v61 = vadd.f32 %v1659_v53, %v1657_v7 }
 0x304   :  { %1661 = vst [vmem:[#allocation3] sm:$0x1] %v1660_v61 }
 0x305   :  { %2139 = shalt.err (!%p2136_p4)
}
 0x306   :  { %s2140_s11 = scalar_lea.hbm %s2934_s8, 16 }
 0x307   :  { %p2141_p5 = scmp.ne.s32.totalorder %s2934_s8, %s2140_s11  ;;  %p2144_p6 = scmp.lt.u32.totalorder %s2140_s11, %s2934_s8 }
 0x309   :  { %p2146_p7 = pnand %p2144_p6, %p2141_p5 }
 0x30b   :  { %2149 = shalt.err (!%p2146_p7)
}
 0x30c   :  { %1671 = dma.vmem_to_hbm [thread:$0]  %s1669_s3, 16, %s2934_s8, [#allocation4]  }
 0x30d   :  { %2150 = dma.done.wait [#allocation4], 16  }
 0x30e   :  { %2151 = vsyncadd [#allocation4], 4294967280 }
 0x30f   :  { %1675 = vsyncpa [#allocation4], 1 }

</bundles_post_ra>
